<compile_context>
chip_gen: v7x
topology: tpu7x:2x2x1
jax: 0.10.0
libtpu: 0.0.40
codegen_flags: <defaults>
</compile_context>

<pallas_src>
import math

import jax
import jax.numpy as jnp
from jax.experimental import pallas as pl
from jax.experimental.pallas import tpu as pltpu

# ----------------------------- model config ---------------------------------
S, B = 8, 2                 # seq_len, batch
BS = B * S
INPUT_DIM = 50              # vocab size
HIDDEN = 32                 # d_model
OUTPUT_DIM = 10
OUT_PAD = 128               # lane-dense padded decoder width
N_HEADS = 4
N_LAYERS = 2
DFF = 2048                  # nn.TransformerEncoderLayer default dim_feedforward
HEAD_DIM = HIDDEN // N_HEADS
LN_EPS = 1e-5
MAX_LEN = 5000
N_SMALL = 9                 # packed small per-layer params (rows of `smalls`)
# smalls row order: 0 bq(scaled) 1 bk 2 bv 3 bo 4 ln1g 5 ln1b 6 b2 7 ln2g 8 ln2b


def _layer_norm(x, gamma, beta):
    mu = jnp.mean(x, axis=-1, keepdims=True)
    var = jnp.mean((x - mu) ** 2, axis=-1, keepdims=True)
    return (x - mu) * jax.lax.rsqrt(var + LN_EPS) * gamma + beta


# ------------------------------ fused Pallas kernel --------------------------
def fused_kernel(x_ref, mask_ref, wq_ref, wk_ref, wv_ref, wo_ref,
                 w1_ref, b1_ref, w2_ref, sm_ref, dw_ref, db_ref,
                 o_ref, x_scr):
    l = pl.program_id(0)

    @pl.when(l == 0)
    def _():
        x_scr[...] = x_ref[...]

    x = x_scr[...]                                     # (BS, H) f32, carried
    sm = sm_ref[...]                                   # (9, H) f32
    bq, bk, bv, bo = sm[0:1, :], sm[1:2, :], sm[2:3, :], sm[3:4, :]
    ln1g, ln1b = sm[4:5, :], sm[5:6, :]
    b2 = sm[6:7, :]
    ln2g, ln2b = sm[7:8, :], sm[8:9, :]

    # ---- self-attention (scale already folded into wq/bq) ----
    xb = x.astype(jnp.bfloat16)
    q = jnp.dot(xb, wq_ref[...], preferred_element_type=jnp.float32) + bq
    k = jnp.dot(xb, wk_ref[...], preferred_element_type=jnp.float32) + bk
    v = jnp.dot(xb, wv_ref[...], preferred_element_type=jnp.float32) + bv

    neg = mask_ref[...]                                # (BS, BS) additive cross-batch mask
    dn = (((1,), (1,)), ((), ()))                      # contract last dims: q @ k^T
    ctx_heads = []
    for h in range(N_HEADS):                           # 4 iters, fully unrolled
        c0 = h * HEAD_DIM
        qh = q[:, c0:c0 + HEAD_DIM]
        kh = k[:, c0:c0 + HEAD_DIM]
        vh = v[:, c0:c0 + HEAD_DIM]
        s = jax.lax.dot_general(qh, kh, dn,
                                preferred_element_type=jnp.float32) + neg
        s = s - jnp.max(s, axis=-1, keepdims=True)
        p = jnp.exp(s)
        p = p * pl.reciprocal(jnp.sum(p, axis=-1, keepdims=True), approx=True)
        ctx_heads.append(jnp.dot(p, vh, preferred_element_type=jnp.float32))
    ctx = jnp.concatenate(ctx_heads, axis=1)           # (BS, H)

    attn = jnp.dot(ctx.astype(jnp.bfloat16), wo_ref[...],
                   preferred_element_type=jnp.float32) + bo
    y = _layer_norm(x + attn, ln1g, ln1b)

    # ---- FFN: bf16 operands on the MXU, f32 accumulation ----
    h1 = jnp.dot(y.astype(jnp.bfloat16), w1_ref[...],
                 preferred_element_type=jnp.float32) + b1_ref[...]
    h1 = jnp.maximum(h1, 0.0)
    ffn = jnp.dot(h1.astype(jnp.bfloat16), w2_ref[...],
                  preferred_element_type=jnp.float32) + b2
    x_new = _layer_norm(y + ffn, ln2g, ln2b)
    x_scr[...] = x_new

    # ---- decoder head (lane-dense, padded to 128) on the last layer step ----
    @pl.when(l == N_LAYERS - 1)
    def _():
        o_ref[...] = jnp.dot(x_new.astype(jnp.bfloat16), dw_ref[...],
                             preferred_element_type=jnp.float32) + db_ref[...]


# ------------------------------ forward pass ---------------------------------
def pallas_transformer_forward(src, kp):
    # embedding lookup + sqrt(d_model) scaling + positional encoding (glue, JAX)
    x = kp['embedding'][src] * math.sqrt(HIDDEN) + kp['pe'][:src.shape[0]]   # (S,B,H)
    # kernel layout: (B*S, H), batch-major rows
    x2 = jnp.transpose(x, (1, 0, 2)).reshape(BS, HIDDEN)

    in_specs = [
        pl.BlockSpec((BS, HIDDEN), lambda l: (0, 0)),                 # x2 (resident)
        pl.BlockSpec((BS, BS), lambda l: (0, 0)),                     # attn mask
        pl.BlockSpec((None, HIDDEN, HIDDEN), lambda l: (l, 0, 0)),    # wq (scaled)
        pl.BlockSpec((None, HIDDEN, HIDDEN), lambda l: (l, 0, 0)),    # wk
        pl.BlockSpec((None, HIDDEN, HIDDEN), lambda l: (l, 0, 0)),    # wv
        pl.BlockSpec((None, HIDDEN, HIDDEN), lambda l: (l, 0, 0)),    # wo
        pl.BlockSpec((None, HIDDEN, DFF), lambda l: (l, 0, 0)),       # w1
        pl.BlockSpec((None, 1, DFF), lambda l: (l, 0, 0)),            # b1
        pl.BlockSpec((None, DFF, HIDDEN), lambda l: (l, 0, 0)),       # w2
        pl.BlockSpec((None, N_SMALL, HIDDEN), lambda l: (l, 0, 0)),   # packed smalls
        pl.BlockSpec((HIDDEN, OUT_PAD), lambda l: (0, 0)),            # decoder W
        pl.BlockSpec((1, OUT_PAD), lambda l: (0, 0)),                 # decoder b
    ]
    out_specs = pl.BlockSpec((BS, OUT_PAD), lambda l: (0, 0))

    out2 = pl.pallas_call(
        fused_kernel,
        out_shape=jax.ShapeDtypeStruct((BS, OUT_PAD), jnp.float32),
        grid_spec=pltpu.PrefetchScalarGridSpec(
            num_scalar_prefetch=0,
            grid=(N_LAYERS,),
            in_specs=in_specs,
            out_specs=out_specs,
            scratch_shapes=[pltpu.VMEM((BS, HIDDEN), jnp.float32)],
        ),
        compiler_params=pltpu.CompilerParams(
            dimension_semantics=("arbitrary",)),
    )(x2, kp['mask'], kp['wq'], kp['wk'], kp['wv'], kp['wo'],
      kp['w1'], kp['b1'], kp['w2'], kp['smalls'], kp['dec_w'], kp['dec_b'])

    # back to PyTorch (S, B, output_dim)
    return out2[:, :OUTPUT_DIM].reshape(B, S, OUTPUT_DIM).transpose(1, 0, 2)


# --------------------------- pure-JAX reference -------------------------------
def reference_forward(src, params):
    prec = jax.lax.Precision.HIGHEST
    S_ = src.shape[0]
    x = params['embedding'][src] * math.sqrt(HIDDEN) + params['pe'][:S_]
    for lp in params['layers']:
        q = jnp.einsum('sbh,hf->sbf', x, lp['wq'], precision=prec) + lp['bq']
        k = jnp.einsum('sbh,hf->sbf', x, lp['wk'], precision=prec) + lp['bk']
        v = jnp.einsum('sbh,hf->sbf', x, lp['wv'], precision=prec) + lp['bv']

        def split_heads(t):   # (S,B,H) -> (B, nH, S, hd)
            return t.reshape(S_, B, N_HEADS, HEAD_DIM).transpose(1, 2, 0, 3)

        qh, kh, vh = split_heads(q), split_heads(k), split_heads(v)
        scores = jnp.einsum('bnsd,bntd->bnst', qh, kh, precision=prec) / math.sqrt(HEAD_DIM)
        p = jax.nn.softmax(scores, axis=-1)
        ctx = jnp.einsum('bnst,bntd->bnsd', p, vh, precision=prec)
        ctx = ctx.transpose(2, 0, 1, 3).reshape(S_, B, HIDDEN)
        attn = jnp.einsum('sbh,hf->sbf', ctx, lp['wo'], precision=prec) + lp['bo']
        x = _layer_norm(x + attn, lp['ln1g'], lp['ln1b'])
        h1 = jax.nn.relu(jnp.einsum('sbh,hf->sbf', x, lp['w1'], precision=prec) + lp['b1'])
        ffn = jnp.einsum('sbf,fh->sbh', h1, lp['w2'], precision=prec) + lp['b2']
        x = _layer_norm(x + ffn, lp['ln2g'], lp['ln2b'])
    return jnp.einsum('sbh,hf->sbf', x, params['decoder_w'], precision=prec) \
        + params['decoder_b']


# ------------------------------ param init -----------------------------------
def init_params(key):
    ks = iter(jax.random.split(key, 64))

    def w(shape, std=0.02):
        return std * jax.random.normal(next(ks), shape, dtype=jnp.float32)

    # positional encoding table, identical formula to PositionalEncoding
    position = jnp.arange(MAX_LEN, dtype=jnp.float32)[:, None]
    div_term = jnp.exp(jnp.arange(0, HIDDEN, 2, dtype=jnp.float32)
                       * (-math.log(10000.0) / HIDDEN))
    ang = position * div_term
    pe = jnp.stack([jnp.sin(ang), jnp.cos(ang)], axis=-1).reshape(MAX_LEN, HIDDEN)
    pe = pe[:, None, :]                                  # (MAX_LEN, 1, H)

    layers = []
    for _ in range(N_LAYERS):
        layers.append(dict(
            # canonical f32 weights, pre-transposed to (in, out); 1-D biases
            wq=w((HIDDEN, HIDDEN)), bq=0.01 * w((HIDDEN,), 1.0),
            wk=w((HIDDEN, HIDDEN)), bk=0.01 * w((HIDDEN,), 1.0),
            wv=w((HIDDEN, HIDDEN)), bv=0.01 * w((HIDDEN,), 1.0),
            wo=w((HIDDEN, HIDDEN)), bo=0.01 * w((HIDDEN,), 1.0),
            ln1g=jnp.ones((HIDDEN,), jnp.float32),
            ln1b=jnp.zeros((HIDDEN,), jnp.float32),
            w1=w((HIDDEN, DFF)), b1=0.01 * w((DFF,), 1.0),
            w2=w((DFF, HIDDEN)), b2=0.01 * w((HIDDEN,), 1.0),
            ln2g=jnp.ones((HIDDEN,), jnp.float32),
            ln2b=jnp.zeros((HIDDEN,), jnp.float32),
        ))

    return dict(
        embedding=jax.random.normal(next(ks), (INPUT_DIM, HIDDEN), dtype=jnp.float32),
        pe=pe,
        layers=layers,
        decoder_w=w((HIDDEN, OUTPUT_DIM)),
        decoder_b=0.01 * w((OUTPUT_DIM,), 1.0),
    )


def prepare_kernel_params(params):
    """One-time, host-side packing into kernel-ready stacked / padded arrays."""
    scale = 1.0 / math.sqrt(HEAD_DIM)
    ls = params['layers']

    def stack(key, mul=1.0):
        return jnp.stack([lp[key] * mul for lp in ls])

    smalls = jnp.stack([
        jnp.stack([lp['bq'] * scale, lp['bk'], lp['bv'], lp['bo'],
                   lp['ln1g'], lp['ln1b'], lp['b2'], lp['ln2g'], lp['ln2b']])
        for lp in ls])                                           # (L, 9, H) f32

    dec_w = jnp.zeros((HIDDEN, OUT_PAD), jnp.float32).at[:, :OUTPUT_DIM].set(
        params['decoder_w'])
    dec_b = jnp.zeros((1, OUT_PAD), jnp.float32).at[0, :OUTPUT_DIM].set(
        params['decoder_b'])

    # additive cross-batch mask: rows/cols grouped batch-major in blocks of S
    row_b = jnp.arange(BS)[:, None] // S
    col_b = jnp.arange(BS)[None, :] // S
    mask = jnp.where(row_b == col_b, 0.0, -1e30).astype(jnp.float32)

    return dict(
        embedding=params['embedding'], pe=params['pe'], mask=mask,
        wq=stack('wq', scale).astype(jnp.bfloat16),   # 1/sqrt(hd) folded into Q
        wk=stack('wk').astype(jnp.bfloat16),
        wv=stack('wv').astype(jnp.bfloat16),
        wo=stack('wo').astype(jnp.bfloat16),
        w1=stack('w1').astype(jnp.bfloat16),
        w2=stack('w2').astype(jnp.bfloat16),
        b1=jnp.stack([lp['b1'].reshape(1, DFF) for lp in ls]),   # (L,1,DFF) f32
        smalls=smalls,
        dec_w=dec_w.astype(jnp.bfloat16),
        dec_b=dec_b,
    )


# ---------------------------------- main --------------------------------------
if __name__ == "__main__":
    key = jax.random.PRNGKey(0)
    k_src, k_params = jax.random.split(key)
    src = jax.random.randint(k_src, (S, B), 0, INPUT_DIM, dtype=jnp.int32)
    params = init_params(k_params)
    kparams = prepare_kernel_params(params)

    out = jax.jit(pallas_transformer_forward)(src, kparams)
    out = jax.block_until_ready(out)
    assert out.shape == (S, B, OUTPUT_DIM) and out.dtype == jnp.float32

    ref = jax.block_until_ready(reference_forward(src, params))
    max_diff = float(jnp.max(jnp.abs(out - ref)))
    assert max_diff < 2e-2, f"mismatch vs reference: {max_diff}"

    print("KERNEL_OK")
</pallas_src>

<mosaic_0001>
module attributes {stable_mosaic.version = 11 : i64} {
  func.func @fused_kernel(%arg0: i32, %arg1: memref<16x32xf32, #tpu.memory_space<vmem>>, %arg2: memref<16x16xf32, #tpu.memory_space<vmem>>, %arg3: memref<1x32x32xbf16, #tpu.memory_space<vmem>>, %arg4: memref<1x32x32xbf16, #tpu.memory_space<vmem>>, %arg5: memref<1x32x32xbf16, #tpu.memory_space<vmem>>, %arg6: memref<1x32x32xbf16, #tpu.memory_space<vmem>>, %arg7: memref<1x32x2048xbf16, #tpu.memory_space<vmem>>, %arg8: memref<1x1x2048xf32, #tpu.memory_space<vmem>>, %arg9: memref<1x2048x32xbf16, #tpu.memory_space<vmem>>, %arg10: memref<1x9x32xf32, #tpu.memory_space<vmem>>, %arg11: memref<32x128xbf16, #tpu.memory_space<vmem>>, %arg12: memref<1x128xf32, #tpu.memory_space<vmem>>, %arg13: memref<16x128xf32, #tpu.memory_space<vmem>>, %arg14: memref<16x32xf32, #tpu.memory_space<vmem>>) attributes {dimension_semantics = [#tpu.dimension_semantics<arbitrary>], iteration_bounds = array<i64: 2>, scalar_prefetch = 0 : i64, scratch_operands = 1 : i64, tpu.core_type = #tpu.core_type<tc>, window_params = [{pipeline_mode = #tpu.pipeline_mode<synchronous>, transform_indices = @transform_0, window_bounds = array<i64: 16, 32>}, {pipeline_mode = #tpu.pipeline_mode<synchronous>, transform_indices = @transform_1, window_bounds = array<i64: 16, 16>}, {transform_indices = @transform_2, window_bounds = array<i64: 1, 32, 32>}, {transform_indices = @transform_3, window_bounds = array<i64: 1, 32, 32>}, {transform_indices = @transform_4, window_bounds = array<i64: 1, 32, 32>}, {transform_indices = @transform_5, window_bounds = array<i64: 1, 32, 32>}, {transform_indices = @transform_6, window_bounds = array<i64: 1, 32, 2048>}, {transform_indices = @transform_7, window_bounds = array<i64: 1, 1, 2048>}, {transform_indices = @transform_8, window_bounds = array<i64: 1, 2048, 32>}, {transform_indices = @transform_9, window_bounds = array<i64: 1, 9, 32>}, {pipeline_mode = #tpu.pipeline_mode<synchronous>, transform_indices = @transform_10, window_bounds = array<i64: 32, 128>}, {pipeline_mode = #tpu.pipeline_mode<synchronous>, transform_indices = @transform_11, window_bounds = array<i64: 1, 128>}, {pipeline_mode = #tpu.pipeline_mode<synchronous>, transform_indices = @transform_12, window_bounds = array<i64: 16, 128>}]} {
    %c0_i32 = arith.constant 0 : i32
    %0 = arith.cmpi eq, %arg0, %c0_i32 : i32
    %1 = arith.extui %0 : i1 to i32
    %c0_i32_0 = arith.constant 0 : i32
    %2 = arith.cmpi ne, %1, %c0_i32_0 : i32
    scf.if %2 {
      %c0_63 = arith.constant 0 : index
      %c0_64 = arith.constant 0 : index
      %169 = vector.load %arg1[%c0_63, %c0_64] : memref<16x32xf32, #tpu.memory_space<vmem>>, vector<16x32xf32>
      %c0_65 = arith.constant 0 : index
      %c0_66 = arith.constant 0 : index
      %170 = vector.load %arg14[%c0_65, %c0_66] : memref<16x32xf32, #tpu.memory_space<vmem>>, vector<16x32xf32>
      tpu.vector_store %arg14[%c0_65, %c0_66], %169 {strides = array<i32>} : memref<16x32xf32, #tpu.memory_space<vmem>>, vector<16x32xf32>,
    } else {
    }
    %c0 = arith.constant 0 : index
    %c0_1 = arith.constant 0 : index
    %3 = vector.load %arg14[%c0, %c0_1] : memref<16x32xf32, #tpu.memory_space<vmem>>, vector<16x32xf32>
    %c0_2 = arith.constant 0 : index
    %c0_3 = arith.constant 0 : index
    %c0_4 = arith.constant 0 : index
    %4 = vector.load %arg10[%c0_2, %c0_3, %c0_4] : memref<1x9x32xf32, #tpu.memory_space<vmem>>, vector<1x9x32xf32>
    %5 = vector.shape_cast %4 : vector<1x9x32xf32> to vector<9x32xf32>
    %6 = vector.extract_strided_slice %5 {offsets = [0, 0], sizes = [1, 32], strides = [1, 1]} : vector<9x32xf32> to vector<1x32xf32>
    %7 = vector.extract_strided_slice %5 {offsets = [1, 0], sizes = [1, 32], strides = [1, 1]} : vector<9x32xf32> to vector<1x32xf32>
    %8 = vector.extract_strided_slice %5 {offsets = [2, 0], sizes = [1, 32], strides = [1, 1]} : vector<9x32xf32> to vector<1x32xf32>
    %9 = vector.extract_strided_slice %5 {offsets = [3, 0], sizes = [1, 32], strides = [1, 1]} : vector<9x32xf32> to vector<1x32xf32>
    %10 = vector.extract_strided_slice %5 {offsets = [4, 0], sizes = [1, 32], strides = [1, 1]} : vector<9x32xf32> to vector<1x32xf32>
    %11 = vector.extract_strided_slice %5 {offsets = [5, 0], sizes = [1, 32], strides = [1, 1]} : vector<9x32xf32> to vector<1x32xf32>
    %12 = vector.extract_strided_slice %5 {offsets = [6, 0], sizes = [1, 32], strides = [1, 1]} : vector<9x32xf32> to vector<1x32xf32>
    %13 = vector.extract_strided_slice %5 {offsets = [7, 0], sizes = [1, 32], strides = [1, 1]} : vector<9x32xf32> to vector<1x32xf32>
    %14 = vector.extract_strided_slice %5 {offsets = [8, 0], sizes = [1, 32], strides = [1, 1]} : vector<9x32xf32> to vector<1x32xf32>
    %15 = arith.truncf %3 : vector<16x32xf32> to vector<16x32xbf16>
    %c0_5 = arith.constant 0 : index
    %c0_6 = arith.constant 0 : index
    %c0_7 = arith.constant 0 : index
    %16 = vector.load %arg3[%c0_5, %c0_6, %c0_7] : memref<1x32x32xbf16, #tpu.memory_space<vmem>>, vector<1x32x32xbf16>
    %17 = vector.shape_cast %16 : vector<1x32x32xbf16> to vector<32x32xbf16>
    %cst = arith.constant dense<0.000000e+00> : vector<16x32xf32>
    %18 = tpu.matmul %15, %17, %cst {dimension_numbers = #tpu.dot_dimension_numbers<[1], [0], [0], [1], [0, 0, 1, 1], [], []>} : vector<16x32xbf16>, vector<32x32xbf16>, vector<16x32xf32> -> vector<16x32xf32>
    %19 = vector.broadcast %6 : vector<1x32xf32> to vector<16x32xf32>
    %20 = arith.addf %18, %19 : vector<16x32xf32>
    %c0_8 = arith.constant 0 : index
    %c0_9 = arith.constant 0 : index
    %c0_10 = arith.constant 0 : index
    %21 = vector.load %arg4[%c0_8, %c0_9, %c0_10] : memref<1x32x32xbf16, #tpu.memory_space<vmem>>, vector<1x32x32xbf16>
    %22 = vector.shape_cast %21 : vector<1x32x32xbf16> to vector<32x32xbf16>
    %cst_11 = arith.constant dense<0.000000e+00> : vector<16x32xf32>
    %23 = tpu.matmul %15, %22, %cst_11 {dimension_numbers = #tpu.dot_dimension_numbers<[1], [0], [0], [1], [0, 0, 1, 1], [], []>} : vector<16x32xbf16>, vector<32x32xbf16>, vector<16x32xf32> -> vector<16x32xf32>
    %24 = vector.broadcast %7 : vector<1x32xf32> to vector<16x32xf32>
    %25 = arith.addf %23, %24 : vector<16x32xf32>
    %c0_12 = arith.constant 0 : index
    %c0_13 = arith.constant 0 : index
    %c0_14 = arith.constant 0 : index
    %26 = vector.load %arg5[%c0_12, %c0_13, %c0_14] : memref<1x32x32xbf16, #tpu.memory_space<vmem>>, vector<1x32x32xbf16>
    %27 = vector.shape_cast %26 : vector<1x32x32xbf16> to vector<32x32xbf16>
    %cst_15 = arith.constant dense<0.000000e+00> : vector<16x32xf32>
    %28 = tpu.matmul %15, %27, %cst_15 {dimension_numbers = #tpu.dot_dimension_numbers<[1], [0], [0], [1], [0, 0, 1, 1], [], []>} : vector<16x32xbf16>, vector<32x32xbf16>, vector<16x32xf32> -> vector<16x32xf32>
    %29 = vector.broadcast %8 : vector<1x32xf32> to vector<16x32xf32>
    %30 = arith.addf %28, %29 : vector<16x32xf32>
    %c0_16 = arith.constant 0 : index
    %c0_17 = arith.constant 0 : index
    %31 = vector.load %arg2[%c0_16, %c0_17] : memref<16x16xf32, #tpu.memory_space<vmem>>, vector<16x16xf32>
    %32 = vector.extract_strided_slice %20 {offsets = [0, 0], sizes = [16, 8], strides = [1, 1]} : vector<16x32xf32> to vector<16x8xf32>
    %33 = vector.extract_strided_slice %25 {offsets = [0, 0], sizes = [16, 8], strides = [1, 1]} : vector<16x32xf32> to vector<16x8xf32>
    %34 = vector.extract_strided_slice %30 {offsets = [0, 0], sizes = [16, 8], strides = [1, 1]} : vector<16x32xf32> to vector<16x8xf32>
    %cst_18 = arith.constant dense<0.000000e+00> : vector<16x16xf32>
    %35 = tpu.matmul %32, %33, %cst_18 {dimension_numbers = #tpu.dot_dimension_numbers<[1], [1], [0], [0], [0, 0, 1, 0], [], []>} : vector<16x8xf32>, vector<16x8xf32>, vector<16x16xf32> -> vector<16x16xf32>
    %36 = arith.addf %35, %31 : vector<16x16xf32>
    %cst_19 = arith.constant dense<0xFF800000> : vector<16xf32>
    %37 = vector.multi_reduction <maximumf>, %36, %cst_19 [1] : vector<16x16xf32> to vector<16xf32>
    %38 = vector.shape_cast %37 : vector<16xf32> to vector<16x1xf32>
    %39 = vector.broadcast %38 : vector<16x1xf32> to vector<16x16xf32>
    %40 = arith.subf %36, %39 : vector<16x16xf32>
    %41 = math.exp %40 : vector<16x16xf32>
    %cst_20 = arith.constant dense<0.000000e+00> : vector<16xf32>
    %42 = vector.multi_reduction <add>, %41, %cst_20 [1] : vector<16x16xf32> to vector<16xf32>
    %43 = vector.shape_cast %42 : vector<16xf32> to vector<16x1xf32>
    %44 = tpu.reciprocal %43 {approx = true} : vector<16x1xf32> -> vector<16x1xf32>
    %45 = vector.broadcast %44 : vector<16x1xf32> to vector<16x16xf32>
    %46 = arith.mulf %41, %45 : vector<16x16xf32>
    %cst_21 = arith.constant dense<0.000000e+00> : vector<16x8xf32>
    %47 = tpu.matmul %46, %34, %cst_21 {dimension_numbers = #tpu.dot_dimension_numbers<[1], [0], [0], [1], [0, 0, 1, 1], [], []>} : vector<16x16xf32>, vector<16x8xf32>, vector<16x8xf32> -> vector<16x8xf32>
    %48 = vector.extract_strided_slice %20 {offsets = [0, 8], sizes = [16, 8], strides = [1, 1]} : vector<16x32xf32> to vector<16x8xf32>
    %49 = vector.extract_strided_slice %25 {offsets = [0, 8], sizes = [16, 8], strides = [1, 1]} : vector<16x32xf32> to vector<16x8xf32>
    %50 = vector.extract_strided_slice %30 {offsets = [0, 8], sizes = [16, 8], strides = [1, 1]} : vector<16x32xf32> to vector<16x8xf32>
    %cst_22 = arith.constant dense<0.000000e+00> : vector<16x16xf32>
    %51 = tpu.matmul %48, %49, %cst_22 {dimension_numbers = #tpu.dot_dimension_numbers<[1], [1], [0], [0], [0, 0, 1, 0], [], []>} : vector<16x8xf32>, vector<16x8xf32>, vector<16x16xf32> -> vector<16x16xf32>
    %52 = arith.addf %51, %31 : vector<16x16xf32>
    %cst_23 = arith.constant dense<0xFF800000> : vector<16xf32>
    %53 = vector.multi_reduction <maximumf>, %52, %cst_23 [1] : vector<16x16xf32> to vector<16xf32>
    %54 = vector.shape_cast %53 : vector<16xf32> to vector<16x1xf32>
    %55 = vector.broadcast %54 : vector<16x1xf32> to vector<16x16xf32>
    %56 = arith.subf %52, %55 : vector<16x16xf32>
    %57 = math.exp %56 : vector<16x16xf32>
    %cst_24 = arith.constant dense<0.000000e+00> : vector<16xf32>
    %58 = vector.multi_reduction <add>, %57, %cst_24 [1] : vector<16x16xf32> to vector<16xf32>
    %59 = vector.shape_cast %58 : vector<16xf32> to vector<16x1xf32>
    %60 = tpu.reciprocal %59 {approx = true} : vector<16x1xf32> -> vector<16x1xf32>
    %61 = vector.broadcast %60 : vector<16x1xf32> to vector<16x16xf32>
    %62 = arith.mulf %57, %61 : vector<16x16xf32>
    %cst_25 = arith.constant dense<0.000000e+00> : vector<16x8xf32>
    %63 = tpu.matmul %62, %50, %cst_25 {dimension_numbers = #tpu.dot_dimension_numbers<[1], [0], [0], [1], [0, 0, 1, 1], [], []>} : vector<16x16xf32>, vector<16x8xf32>, vector<16x8xf32> -> vector<16x8xf32>
    %64 = vector.extract_strided_slice %20 {offsets = [0, 16], sizes = [16, 8], strides = [1, 1]} : vector<16x32xf32> to vector<16x8xf32>
    %65 = vector.extract_strided_slice %25 {offsets = [0, 16], sizes = [16, 8], strides = [1, 1]} : vector<16x32xf32> to vector<16x8xf32>
    %66 = vector.extract_strided_slice %30 {offsets = [0, 16], sizes = [16, 8], strides = [1, 1]} : vector<16x32xf32> to vector<16x8xf32>
    %cst_26 = arith.constant dense<0.000000e+00> : vector<16x16xf32>
    %67 = tpu.matmul %64, %65, %cst_26 {dimension_numbers = #tpu.dot_dimension_numbers<[1], [1], [0], [0], [0, 0, 1, 0], [], []>} : vector<16x8xf32>, vector<16x8xf32>, vector<16x16xf32> -> vector<16x16xf32>
    %68 = arith.addf %67, %31 : vector<16x16xf32>
    %cst_27 = arith.constant dense<0xFF800000> : vector<16xf32>
    %69 = vector.multi_reduction <maximumf>, %68, %cst_27 [1] : vector<16x16xf32> to vector<16xf32>
    %70 = vector.shape_cast %69 : vector<16xf32> to vector<16x1xf32>
    %71 = vector.broadcast %70 : vector<16x1xf32> to vector<16x16xf32>
    %72 = arith.subf %68, %71 : vector<16x16xf32>
    %73 = math.exp %72 : vector<16x16xf32>
    %cst_28 = arith.constant dense<0.000000e+00> : vector<16xf32>
    %74 = vector.multi_reduction <add>, %73, %cst_28 [1] : vector<16x16xf32> to vector<16xf32>
    %75 = vector.shape_cast %74 : vector<16xf32> to vector<16x1xf32>
    %76 = tpu.reciprocal %75 {approx = true} : vector<16x1xf32> -> vector<16x1xf32>
    %77 = vector.broadcast %76 : vector<16x1xf32> to vector<16x16xf32>
    %78 = arith.mulf %73, %77 : vector<16x16xf32>
    %cst_29 = arith.constant dense<0.000000e+00> : vector<16x8xf32>
    %79 = tpu.matmul %78, %66, %cst_29 {dimension_numbers = #tpu.dot_dimension_numbers<[1], [0], [0], [1], [0, 0, 1, 1], [], []>} : vector<16x16xf32>, vector<16x8xf32>, vector<16x8xf32> -> vector<16x8xf32>
    %80 = vector.extract_strided_slice %20 {offsets = [0, 24], sizes = [16, 8], strides = [1, 1]} : vector<16x32xf32> to vector<16x8xf32>
    %81 = vector.extract_strided_slice %25 {offsets = [0, 24], sizes = [16, 8], strides = [1, 1]} : vector<16x32xf32> to vector<16x8xf32>
    %82 = vector.extract_strided_slice %30 {offsets = [0, 24], sizes = [16, 8], strides = [1, 1]} : vector<16x32xf32> to vector<16x8xf32>
    %cst_30 = arith.constant dense<0.000000e+00> : vector<16x16xf32>
    %83 = tpu.matmul %80, %81, %cst_30 {dimension_numbers = #tpu.dot_dimension_numbers<[1], [1], [0], [0], [0, 0, 1, 0], [], []>} : vector<16x8xf32>, vector<16x8xf32>, vector<16x16xf32> -> vector<16x16xf32>
    %84 = arith.addf %83, %31 : vector<16x16xf32>
    %cst_31 = arith.constant dense<0xFF800000> : vector<16xf32>
    %85 = vector.multi_reduction <maximumf>, %84, %cst_31 [1] : vector<16x16xf32> to vector<16xf32>
    %86 = vector.shape_cast %85 : vector<16xf32> to vector<16x1xf32>
    %87 = vector.broadcast %86 : vector<16x1xf32> to vector<16x16xf32>
    %88 = arith.subf %84, %87 : vector<16x16xf32>
    %89 = math.exp %88 : vector<16x16xf32>
    %cst_32 = arith.constant dense<0.000000e+00> : vector<16xf32>
    %90 = vector.multi_reduction <add>, %89, %cst_32 [1] : vector<16x16xf32> to vector<16xf32>
    %91 = vector.shape_cast %90 : vector<16xf32> to vector<16x1xf32>
    %92 = tpu.reciprocal %91 {approx = true} : vector<16x1xf32> -> vector<16x1xf32>
    %93 = vector.broadcast %92 : vector<16x1xf32> to vector<16x16xf32>
    %94 = arith.mulf %89, %93 : vector<16x16xf32>
    %cst_33 = arith.constant dense<0.000000e+00> : vector<16x8xf32>
    %95 = tpu.matmul %94, %82, %cst_33 {dimension_numbers = #tpu.dot_dimension_numbers<[1], [0], [0], [1], [0, 0, 1, 1], [], []>} : vector<16x16xf32>, vector<16x8xf32>, vector<16x8xf32> -> vector<16x8xf32>
    %96 = tpu.concatenate %47, %63, %79, %95 in 1 : vector<16x8xf32>, vector<16x8xf32>, vector<16x8xf32>, vector<16x8xf32> -> vector<16x32xf32>
    %97 = arith.truncf %96 : vector<16x32xf32> to vector<16x32xbf16>
    %c0_34 = arith.constant 0 : index
    %c0_35 = arith.constant 0 : index
    %c0_36 = arith.constant 0 : index
    %98 = vector.load %arg6[%c0_34, %c0_35, %c0_36] : memref<1x32x32xbf16, #tpu.memory_space<vmem>>, vector<1x32x32xbf16>
    %99 = vector.shape_cast %98 : vector<1x32x32xbf16> to vector<32x32xbf16>
    %cst_37 = arith.constant dense<0.000000e+00> : vector<16x32xf32>
    %100 = tpu.matmul %97, %99, %cst_37 {dimension_numbers = #tpu.dot_dimension_numbers<[1], [0], [0], [1], [0, 0, 1, 1], [], []>} : vector<16x32xbf16>, vector<32x32xbf16>, vector<16x32xf32> -> vector<16x32xf32>
    %101 = vector.broadcast %9 : vector<1x32xf32> to vector<16x32xf32>
    %102 = arith.addf %100, %101 : vector<16x32xf32>
    %103 = arith.addf %3, %102 : vector<16x32xf32>
    %cst_38 = arith.constant dense<0.000000e+00> : vector<16xf32>
    %104 = vector.multi_reduction <add>, %103, %cst_38 [1] : vector<16x32xf32> to vector<16xf32>
    %105 = vector.shape_cast %104 : vector<16xf32> to vector<16x1xf32>
    %cst_39 = arith.constant 3.200000e+01 : f32
    %106 = vector.broadcast %cst_39 : f32 to vector<16x1xf32>
    %107 = arith.divf %105, %106 : vector<16x1xf32>
    %108 = vector.broadcast %107 : vector<16x1xf32> to vector<16x32xf32>
    %109 = arith.subf %103, %108 : vector<16x32xf32>
    %110 = arith.mulf %109, %109 : vector<16x32xf32>
    %cst_40 = arith.constant dense<0.000000e+00> : vector<16xf32>
    %111 = vector.multi_reduction <add>, %110, %cst_40 [1] : vector<16x32xf32> to vector<16xf32>
    %112 = vector.shape_cast %111 : vector<16xf32> to vector<16x1xf32>
    %cst_41 = arith.constant 3.200000e+01 : f32
    %113 = vector.broadcast %cst_41 : f32 to vector<16x1xf32>
    %114 = arith.divf %112, %113 : vector<16x1xf32>
    %115 = vector.broadcast %107 : vector<16x1xf32> to vector<16x32xf32>
    %116 = arith.subf %103, %115 : vector<16x32xf32>
    %cst_42 = arith.constant 9.99999974E-6 : f32
    %117 = vector.broadcast %cst_42 : f32 to vector<16x1xf32>
    %118 = arith.addf %114, %117 : vector<16x1xf32>
    %119 = math.rsqrt %118 : vector<16x1xf32>
    %120 = vector.broadcast %119 : vector<16x1xf32> to vector<16x32xf32>
    %121 = arith.mulf %116, %120 : vector<16x32xf32>
    %122 = vector.broadcast %10 : vector<1x32xf32> to vector<16x32xf32>
    %123 = arith.mulf %121, %122 : vector<16x32xf32>
    %124 = vector.broadcast %11 : vector<1x32xf32> to vector<16x32xf32>
    %125 = arith.addf %123, %124 : vector<16x32xf32>
    %126 = arith.truncf %125 : vector<16x32xf32> to vector<16x32xbf16>
    %c0_43 = arith.constant 0 : index
    %c0_44 = arith.constant 0 : index
    %c0_45 = arith.constant 0 : index
    %127 = vector.load %arg7[%c0_43, %c0_44, %c0_45] : memref<1x32x2048xbf16, #tpu.memory_space<vmem>>, vector<1x32x2048xbf16>
    %128 = vector.shape_cast %127 : vector<1x32x2048xbf16> to vector<32x2048xbf16>
    %cst_46 = arith.constant dense<0.000000e+00> : vector<16x2048xf32>
    %129 = tpu.matmul %126, %128, %cst_46 {dimension_numbers = #tpu.dot_dimension_numbers<[1], [0], [0], [1], [0, 0, 1, 1], [], []>} : vector<16x32xbf16>, vector<32x2048xbf16>, vector<16x2048xf32> -> vector<16x2048xf32>
    %c0_47 = arith.constant 0 : index
    %c0_48 = arith.constant 0 : index
    %c0_49 = arith.constant 0 : index
    %130 = vector.load %arg8[%c0_47, %c0_48, %c0_49] : memref<1x1x2048xf32, #tpu.memory_space<vmem>>, vector<1x1x2048xf32>
    %131 = vector.shape_cast %130 : vector<1x1x2048xf32> to vector<1x2048xf32>
    %132 = vector.broadcast %131 : vector<1x2048xf32> to vector<16x2048xf32>
    %133 = arith.addf %129, %132 : vector<16x2048xf32>
    %cst_50 = arith.constant 0.000000e+00 : f32
    %134 = vector.broadcast %cst_50 : f32 to vector<16x2048xf32>
    %135 = arith.maximumf %133, %134 : vector<16x2048xf32>
    %136 = arith.truncf %135 : vector<16x2048xf32> to vector<16x2048xbf16>
    %c0_51 = arith.constant 0 : index
    %c0_52 = arith.constant 0 : index
    %c0_53 = arith.constant 0 : index
    %137 = vector.load %arg9[%c0_51, %c0_52, %c0_53] : memref<1x2048x32xbf16, #tpu.memory_space<vmem>>, vector<1x2048x32xbf16>
    %138 = vector.shape_cast %137 : vector<1x2048x32xbf16> to vector<2048x32xbf16>
    %cst_54 = arith.constant dense<0.000000e+00> : vector<16x32xf32>
    %139 = tpu.matmul %136, %138, %cst_54 {dimension_numbers = #tpu.dot_dimension_numbers<[1], [0], [0], [1], [0, 0, 1, 1], [], []>} : vector<16x2048xbf16>, vector<2048x32xbf16>, vector<16x32xf32> -> vector<16x32xf32>
    %140 = vector.broadcast %12 : vector<1x32xf32> to vector<16x32xf32>
    %141 = arith.addf %139, %140 : vector<16x32xf32>
    %142 = arith.addf %125, %141 : vector<16x32xf32>
    %cst_55 = arith.constant dense<0.000000e+00> : vector<16xf32>
    %143 = vector.multi_reduction <add>, %142, %cst_55 [1] : vector<16x32xf32> to vector<16xf32>
    %144 = vector.shape_cast %143 : vector<16xf32> to vector<16x1xf32>
    %cst_56 = arith.constant 3.200000e+01 : f32
    %145 = vector.broadcast %cst_56 : f32 to vector<16x1xf32>
    %146 = arith.divf %144, %145 : vector<16x1xf32>
    %147 = vector.broadcast %146 : vector<16x1xf32> to vector<16x32xf32>
    %148 = arith.subf %142, %147 : vector<16x32xf32>
    %149 = arith.mulf %148, %148 : vector<16x32xf32>
    %cst_57 = arith.constant dense<0.000000e+00> : vector<16xf32>
    %150 = vector.multi_reduction <add>, %149, %cst_57 [1] : vector<16x32xf32> to vector<16xf32>
    %151 = vector.shape_cast %150 : vector<16xf32> to vector<16x1xf32>
    %cst_58 = arith.constant 3.200000e+01 : f32
    %152 = vector.broadcast %cst_58 : f32 to vector<16x1xf32>
    %153 = arith.divf %151, %152 : vector<16x1xf32>
    %154 = vector.broadcast %146 : vector<16x1xf32> to vector<16x32xf32>
    %155 = arith.subf %142, %154 : vector<16x32xf32>
    %cst_59 = arith.constant 9.99999974E-6 : f32
    %156 = vector.broadcast %cst_59 : f32 to vector<16x1xf32>
    %157 = arith.addf %153, %156 : vector<16x1xf32>
    %158 = math.rsqrt %157 : vector<16x1xf32>
    %159 = vector.broadcast %158 : vector<16x1xf32> to vector<16x32xf32>
    %160 = arith.mulf %155, %159 : vector<16x32xf32>
    %161 = vector.broadcast %13 : vector<1x32xf32> to vector<16x32xf32>
    %162 = arith.mulf %160, %161 : vector<16x32xf32>
    %163 = vector.broadcast %14 : vector<1x32xf32> to vector<16x32xf32>
    %164 = arith.addf %162, %163 : vector<16x32xf32>
    %c0_60 = arith.constant 0 : index
    %c0_61 = arith.constant 0 : index
    %165 = vector.load %arg14[%c0_60, %c0_61] : memref<16x32xf32, #tpu.memory_space<vmem>>, vector<16x32xf32>
    tpu.vector_store %arg14[%c0_60, %c0_61], %164 {strides = array<i32>} : memref<16x32xf32, #tpu.memory_space<vmem>>, vector<16x32xf32>,
    %c1_i32 = arith.constant 1 : i32
    %166 = arith.cmpi eq, %arg0, %c1_i32 : i32
    %167 = arith.extui %166 : i1 to i32
    %c0_i32_62 = arith.constant 0 : i32
    %168 = arith.cmpi ne, %167, %c0_i32_62 : i32
    scf.if %168 {
      %169 = arith.truncf %164 : vector<16x32xf32> to vector<16x32xbf16>
      %c0_63 = arith.constant 0 : index
      %c0_64 = arith.constant 0 : index
      %170 = vector.load %arg11[%c0_63, %c0_64] : memref<32x128xbf16, #tpu.memory_space<vmem>>, vector<32x128xbf16>
      %cst_65 = arith.constant dense<0.000000e+00> : vector<16x128xf32>
      %171 = tpu.matmul %169, %170, %cst_65 {dimension_numbers = #tpu.dot_dimension_numbers<[1], [0], [0], [1], [0, 0, 1, 1], [], []>} : vector<16x32xbf16>, vector<32x128xbf16>, vector<16x128xf32> -> vector<16x128xf32>
      %c0_66 = arith.constant 0 : index
      %c0_67 = arith.constant 0 : index
      %172 = vector.load %arg12[%c0_66, %c0_67] : memref<1x128xf32, #tpu.memory_space<vmem>>, vector<1x128xf32>
      %173 = vector.broadcast %172 : vector<1x128xf32> to vector<16x128xf32>
      %174 = arith.addf %171, %173 : vector<16x128xf32>
      %c0_68 = arith.constant 0 : index
      %c0_69 = arith.constant 0 : index
      %175 = vector.load %arg13[%c0_68, %c0_69] : memref<16x128xf32, #tpu.memory_space<vmem>>, vector<16x128xf32>
      tpu.vector_store %arg13[%c0_68, %c0_69], %174 {strides = array<i32>} : memref<16x128xf32, #tpu.memory_space<vmem>>, vector<16x128xf32>,
    } else {
    }
    return
  }
  func.func @transform_0(%arg0: i32) -> (i32, i32) {
    %c0_i32 = arith.constant 0 : i32
    %c0_i32_0 = arith.constant 0 : i32
    %c0_i32_1 = arith.constant 0 : i32
    return %c0_i32, %c0_i32_0 : i32, i32
  }
  func.func @transform_1(%arg0: i32) -> (i32, i32) {
    %c0_i32 = arith.constant 0 : i32
    %c0_i32_0 = arith.constant 0 : i32
    %c0_i32_1 = arith.constant 0 : i32
    return %c0_i32, %c0_i32_0 : i32, i32
  }
  func.func @transform_2(%arg0: i32) -> (i32, i32, i32) {
    %c0_i32 = arith.constant 0 : i32
    %c0_i32_0 = arith.constant 0 : i32
    %c0_i32_1 = arith.constant 0 : i32
    return %arg0, %c0_i32, %c0_i32_0 : i32, i32, i32
  }
  func.func @transform_3(%arg0: i32) -> (i32, i32, i32) {
    %c0_i32 = arith.constant 0 : i32
    %c0_i32_0 = arith.constant 0 : i32
    %c0_i32_1 = arith.constant 0 : i32
    return %arg0, %c0_i32, %c0_i32_0 : i32, i32, i32
  }
  func.func @transform_4(%arg0: i32) -> (i32, i32, i32) {
    %c0_i32 = arith.constant 0 : i32
    %c0_i32_0 = arith.constant 0 : i32
    %c0_i32_1 = arith.constant 0 : i32
    return %arg0, %c0_i32, %c0_i32_0 : i32, i32, i32
  }
  func.func @transform_5(%arg0: i32) -> (i32, i32, i32) {
    %c0_i32 = arith.constant 0 : i32
    %c0_i32_0 = arith.constant 0 : i32
    %c0_i32_1 = arith.constant 0 : i32
    return %arg0, %c0_i32, %c0_i32_0 : i32, i32, i32
  }
  func.func @transform_6(%arg0: i32) -> (i32, i32, i32) {
    %c0_i32 = arith.constant 0 : i32
    %c0_i32_0 = arith.constant 0 : i32
    %c0_i32_1 = arith.constant 0 : i32
    return %arg0, %c0_i32, %c0_i32_0 : i32, i32, i32
  }
  func.func @transform_7(%arg0: i32) -> (i32, i32, i32) {
    %c0_i32 = arith.constant 0 : i32
    %c0_i32_0 = arith.constant 0 : i32
    %c0_i32_1 = arith.constant 0 : i32
    return %arg0, %c0_i32, %c0_i32_0 : i32, i32, i32
  }
  func.func @transform_8(%arg0: i32) -> (i32, i32, i32) {
    %c0_i32 = arith.constant 0 : i32
    %c0_i32_0 = arith.constant 0 : i32
    %c0_i32_1 = arith.constant 0 : i32
    return %arg0, %c0_i32, %c0_i32_0 : i32, i32, i32
  }
  func.func @transform_9(%arg0: i32) -> (i32, i32, i32) {
    %c0_i32 = arith.constant 0 : i32
    %c0_i32_0 = arith.constant 0 : i32
    %c0_i32_1 = arith.constant 0 : i32
    return %arg0, %c0_i32, %c0_i32_0 : i32, i32, i32
  }
  func.func @transform_10(%arg0: i32) -> (i32, i32) {
    %c0_i32 = arith.constant 0 : i32
    %c0_i32_0 = arith.constant 0 : i32
    %c0_i32_1 = arith.constant 0 : i32
    return %c0_i32, %c0_i32_0 : i32, i32
  }
  func.func @transform_11(%arg0: i32) -> (i32, i32) {
    %c0_i32 = arith.constant 0 : i32
    %c0_i32_0 = arith.constant 0 : i32
    %c0_i32_1 = arith.constant 0 : i32
    return %c0_i32, %c0_i32_0 : i32, i32
  }
  func.func @transform_12(%arg0: i32) -> (i32, i32) {
    %c0_i32 = arith.constant 0 : i32
    %c0_i32_0 = arith.constant 0 : i32
    %c0_i32_1 = arith.constant 0 : i32
    return %c0_i32, %c0_i32_0 : i32, i32
  }
}

</mosaic_0001>

<bundles_post_ra>
// kernel: pallas_transformer_forward.1
= control target key start
LH: loop header
LB: loop body
LE: loop exit
PB: predicated region body
PF: predicated region fallthrough
CT: control target
= control target key end

     0   :  { %s4854_s21 = smov 0   ;;  %s5384_s0 = inlined_call_operand.vmem [shape: f32[16,32], index: 0, kind: input, shape index: {}]   ;;  %s5385_s1 = inlined_call_operand.vmem [shape: f32[16,16], index: 1, kind: input, shape index: {}]   ;;  %s5386_s2 = inlined_call_operand.vmem [shape: bf16[2,32,32], index: 2, kind: input, shape index: {}]   ;;  %s5387_s3 = inlined_call_operand.vmem [shape: bf16[2,32,32], index: 3, kind: input, shape index: {}]   ;;  %s5388_s4 = inlined_call_operand.vmem [shape: bf16[2,32,32], index: 4, kind: input, shape index: {}]   ;;  %s5389_s5 = inlined_call_operand.vmem [shape: bf16[2,32,32], index: 5, kind: input, shape index: {}]   ;;  %s5390_s6 = inlined_call_operand.vmem [shape: bf16[2,32,2048], index: 6, kind: input, shape index: {}]   ;;  %s5391_s7 = inlined_call_operand.vmem [shape: f32[2,1,2048], index: 7, kind: input, shape index: {}]   ;;  %s5392_s8 = inlined_call_operand.vmem [shape: bf16[2,2048,32], index: 8, kind: input, shape index: {}]   ;;  %s5393_s9 = inlined_call_operand.vmem [shape: f32[2,9,32], index: 9, kind: input, shape index: {}]   ;;  %s5394_s10 = inlined_call_operand.vmem [shape: bf16[32,128], index: 10, kind: input, shape index: {}]   ;;  %s5395_s11 = inlined_call_operand.vmem [shape: f32[1,128], index: 11, kind: input, shape index: {}]   ;;  %s5396_s12 = inlined_call_operand.vmem [shape: f32[16,128], index: 12, kind: output, shape index: {}]  }
   0x1   :  { %5398 = sst [smem:[#allocation4_spill]] %s5386_s2 }
   0x2   :  { %5399 = sst [smem:[#allocation5_spill]] %s5387_s3 }
   0x3   :  { %5400 = sst [smem:[#allocation6_spill]] %s5388_s4 }
   0x4 LB: > { %5401 = sst [smem:[#allocation3_spill]] %s4776_s21  ;;  %s4860_s22 = sadd.s32 4294967295, %s4776_s21   ;;  %s4776_s21 = sphi %s4854_s21, %s22_s21  }
   0x5   : > { %p3930_p0 = scmp.ge.s32.totalorder %s4776_s21, 1  ;;  %p426_p1 = scmp.lt.s32.totalorder %s4776_s21, 3 }
   0x7   : > { %p427_p2 = pnand %p3930_p0, %p426_p1 }
   0x8   : > { %p497_p3 = scmp.lt.s32.totalorder (!%p427_p2), %s4860_s22, 1  ;;  %s5402_s2 = sld [smem:[#allocation4_spill]] (!%p427_p2) }
   0x9   : > { %430 = sbr.rel (%p427_p2) target bundleno = 3440 (0xd70), region = 68  ;;  %s5403_s3 = sld [smem:[#allocation5_spill]] (!%p427_p2) }
   0xa   : > { %s5404_s4 = sld [smem:[#allocation6_spill]] (!%p427_p2)  ;;  %p3946_p4 = scmp.ne.s32.totalorder (!%p427_p2), %s4860_s22, 0 }
  0x10   : > { %s498_s23 = scalar_select %p497_p3, %s4860_s22, 1 }
  0x11   : > { %540 = sbr.rel (%p3946_p4) target bundleno = 24 (0x18), region = 72  ;;  %v541_v0 = vld [vmem:[%s5384_s0] sm:$0xff] (!%p3946_p4)  ;;  %vm543_vm0 = vcmask (!%p3946_p4), 261120   ;;  %v542_v1 = vld [vmem:[%s5384_s0 + $0x8] sm:$0xff] (!%p3946_p4) }
  0x12   : > { %s4159_s24 = sshll.u32 %s498_s23, 4  ;;  %s4163_s25 = sshll.u32 %s498_s23, 8  ;;  %544 = vst.msk [vmem:[#allocation2] sm:$0xff] (!%p3946_p4), %vm543_vm0, %v541_v0  ;;  %545 = vst.msk [vmem:[#allocation2 + $0x8] sm:$0xff] (!%p3946_p4), %vm543_vm0, %v542_v1 }
  0x13   : > { %s4869_s28 = scalar_lea.vmem %s5402_s2, %s4159_s24  ;;  %s506_s13 = scalar_lea.vmem %s5403_s3, %s4159_s24 }
  0x14   : > { %s4877_s16 = scalar_lea.vmem %s5404_s4, %s4159_s24  ;;  %s4882_s19 = scalar_lea.vmem %s5389_s5, %s4159_s24 }
  0x15   : > { %s4887_s26 = scalar_lea.vmem %s5390_s6, %s4163_s25  ;;  %s4892_s29 = scalar_lea.vmem %s5391_s7, %s4159_s24 }
  0x16   : > { %s4164_s30 = sshll.u32 %s498_s23, 10  ;;  %s4897_s15 = scalar_lea.vmem %s5393_s9, %s4159_s24 }
  0x17   : > { %s4902_s18 = scalar_lea.vmem %s5392_s8, %s4164_s30 }
  0x18 PF: > { %v4589_v2 = vld [vmem:[%s506_s13] sm:$0xff]   ;;  %v4778_v3 = vmov 0.0   ;;  %v4590_v4 = vld [vmem:[%s506_s13 + $0x8] sm:$0xff]   ;;  %vm4779_vm1 = vmmov 0   ;;  %vm571_vm2 = vcmask 261120   ;;  %v555_v12 = vlaneseq  ;;  %s4780_s3 = smov 112  }
  0x19   : > { %4397 = vmatprep.subr.bf16.mxu1 %v4778_v3  ;;  %4389 = vmatprep.subr.bf16.mxu0 %v4778_v3  ;;  %v546_v5 = vld [vmem:[#allocation2] sm:$0xff]  ;;  %v547_v6 = vld [vmem:[#allocation2 + $0x8] sm:$0xff]  ;;  %vm740_vm3 = vcmask 64512   ;;  %s4781_s4 = smov 120   ;;  %vm828_vm5 = vcmask 130048   ;;  %s4782_s20 = smov 104  }
  0x1a   : > { %4398 = vmatpush3.bf16.msra.mxu1 %v4589_v2  ;;  %4401 = vmatprep.mubr.msk.bf16.mxu1 %vm4779_vm1, %v4778_v3  ;;  %v4591_v7 = vld [vmem:[%s4869_s28] sm:$0xff]   ;;  %v4592_v8 = vld [vmem:[%s4869_s28 + $0x8] sm:$0xff]   ;;  %v550_v9 = vpack.c.bf16 %v547_v6, %v546_v5  ;;  %v4930_v13 = vshrl.u32 %v555_v12, 7  ;;  %vm4951_vm4 = vmpackc.low %vm740_vm3, %vm740_vm3  ;;  %s4783_s27 = smov 8   ;;  %s4784_s30 = smov 16   ;;  %vm1562_vm6 = vcmask 195584  }
  0x1b   : > { %4399 = vmatprep.subr.bf16.mxu1 %v4778_v3  ;;  %4393 = vmatprep.mubr.msk.bf16.mxu0 %vm4779_vm1, %v4778_v3  ;;  %v4593_v10 = vld [vmem:[%s4877_s16] sm:$0xff]   ;;  %v4594_v11 = vld [vmem:[%s4877_s16 + $0x8] sm:$0xff]   ;;  %s4785_s14 = smov 24   ;;  %p4152_p5 = scmp.ne.s32.totalorder %s4860_s22, 1 }
  0x1c   : > { %4390 = vmatpush3.bf16.msra.mxu0 %v4591_v7  ;;  %v4933_v14 = vsub.s32 1, %v4930_v13  ;;  %v4936_v15 = vld [vmem:[%s4897_s15] sm:$0xff]  ;;  %v4939_v16 = vsub.s32 0, %v4930_v13  ;;  %v4978_v34 = vsub.s32 2, %v4930_v13  ;;  %v5000_v55 = vld [vmem:[%s5385_s1 + $0x8] sm:$0xff]  ;;  %vm4788_vm7 = vmmov (!%p4152_p5), 0  }
  0x1d   : > { %4391 = vmatprep.subr.bf16.mxu0 %v4778_v3  ;;  %v5005_v56 = vld [vmem:[%s5385_s1] sm:$0xff] }
  0x1e   : > { %4400 = vmatpush3.bf16.msra.mxu1 %v4590_v4  ;;  %v623_v17 = vrot.slane %v4936_v15, %v4933_v14  ;;  %v558_v19 = vrot.slane %v4936_v15, %v4939_v16  ;;  %v684_v35 = vrot.slane %v4936_v15, %v4978_v34 }
  0x20   : > { %4392 = vmatpush3.bf16.msra.mxu0 %v4592_v8 }
  0x21   : > { %4402 = vmatmul.mubr.msk.bf16.vlgmr.msra.gmra.mrb[0].mxu1 %vm571_vm2, %v550_v9  ;;  %4405 = vmatprep.subr.bf16.mxu0 %v4778_v3 }
  0x23   : > { %4394 = vmatmul.mubr.msk.bf16.vlgmr.msra.gmra.mrb[0].mxu0 %vm571_vm2, %v550_v9 }
  0x24   : > { %4409 = vmatprep.mubr.msk.bf16.mxu0 %vm4779_vm1, %v4778_v3  ;;  %4406 = vmatpush3.bf16.msra.mxu0 %v4593_v10 }
  0x25   : > { %4407 = vmatprep.subr.bf16.mxu0 %v4778_v3 }
  0x28   : > { %4408 = vmatpush3.bf16.msra.mxu0 %v4594_v11 }
  0x2b   : > { %4410 = vmatmul.mubr.msk.bf16.vlgmr.msra.gmra.mrb[4].mxu0 %vm571_vm2, %v550_v9 }
  0xf4   : > { %v670_v18 = vpop.f32.mrb[0].mxu1 }
  0xf5   : > { %v4403_v20 = vpop.f32.mrb[1].mxu1  ;;  %v671_v22 = vadd.f32 %v670_v18, %v623_v17 }
  0xf6   : > { %v673_v21 = vpop.f32.mrb[2].mxu1  ;;  %v609_v25 = vpop.f32.mrb[0].mxu0 }
  0xf7   : > { %v674_v23 = vadd.f32 %v673_v21, %v623_v17  ;;  %v4404_v24 = vpop.f32.mrb[3].mxu1  ;;  %v4945_v26 = vadd.f32 %v609_v25, %v558_v19  ;;  %v4395_v27 = vpop.f32.mrb[1].mxu0 }
  0xf8   : > { %v612_v31 = vpop.f32.mrb[2].mxu0 }
  0xf9   : > { %v4947_v28 = vpack.i.bf16 %v674_v23, %v671_v22  ;;  %v4485_v29 = vpack.c.bf16 %v674_v23, %v671_v22  ;;  %4417 = vmatprep.mubr.msk.f32.mxu1 %vm740_vm3, %v4945_v26  ;;  %v4396_v32 = vpop.f32.mrb[3].mxu0  ;;  %v4961_v33 = vadd.f32 %v612_v31, %v558_v19 }
  0xfb   : > { %4550 = vrot.lane.b32.xlu1 %v4947_v28, %s4780_s3  ;;  %4545 = vrot.lane.b32.xlu0 %v4947_v28, %s4781_s4 }
  0xfc   : > { %4487 = vmatprep.subr.msk.bf16.mxu1 %vm4951_vm4, %v4485_v29 }
  0xfd   : > { %4490 = vmatpush3.bf16.xpose.msk.msra.mxu1 %vm4951_vm4, %v4485_v29 }
  0xfe   : > { %v731_v36 = vpop.f32.mrb[4].mxu0 }
  0xff   : > { %932 = vrot.lane.b32.xlu0 %v4945_v26, %s4781_s4  ;;  %934 = vrot.lane.b32.xlu1 %v4961_v33, %s4781_s4  ;;  %v732_v37 = vadd.f32 %v731_v36, %v684_v35  ;;  %v4411_v38 = vpop.f32.mrb[5].mxu0 }
 0x100   : > { %v734_v39 = vpop.f32.mrb[6].mxu0 }
 0x101   : > { %v735_v40 = vadd.f32 %v734_v39, %v684_v35  ;;  %v4412_v41 = vpop.f32.mrb[7].mxu0 }
 0x103   : > { %1134 = vrot.lane.b32.xlu0 %v4945_v26, %s4780_s3  ;;  %1136 = vrot.lane.b32.xlu1 %v4961_v33, %s4780_s3  ;;  %v4491_v42 = vpack.c.bf16 %v735_v40, %v732_v37  ;;  %v5019_v18 = vpack.i.bf16 %v735_v40, %v732_v37 }
 0x104   : > { %4418 = vmatmul.mubr.msk.f32.vlgmr.msra.gmra.mrb[4].mxu1 %vm740_vm3, %v4961_v33 }
 0x105   : > { %4492 = vmatprep.subr.bf16.mxu1 %v4491_v42 }
 0x106   : > { %4494 = vmatpush3.bf16.msra.mxu1 %v4491_v42 }
 0x16d   : > { %v4551_v43 = vpop.permute.xlu1 %4550  ;;  %v4546_v44 = vpop.permute.xlu0 %4545 }
 0x16e   : > { %v4553_v45 = vunpack.i.h.bf16 %v4551_v43  ;;  %v4552_v46 = vunpack.i.l.bf16 %v4551_v43  ;;  %v4548_v47 = vunpack.i.h.bf16 %v4546_v44  ;;  %v4547_v48 = vunpack.i.l.bf16 %v4546_v44 }
 0x170   : > { %v4495_v49 = vpack.c.bf16 %v4548_v47, %v4547_v48  ;;  %v4505_v51 = vpack.c.bf16 %v4553_v45, %v4552_v46 }
 0x171   : > { %v933_v50 = vpop.permute.xlu0 %932  ;;  %v935_v52 = vpop.permute.xlu1 %934 }
 0x172   : > { %4497 = vmatprep.subr.msk.bf16.mxu0 %vm4951_vm4, %v4495_v49  ;;  %4431 = vmatprep.mubr.msk.f32.mxu0 %vm740_vm3, %v933_v50 }
 0x173   : > { %4500 = vmatpush3.bf16.xpose.msk.msra.mxu0 %vm4951_vm4, %v4495_v49 }
 0x174   : > { %4507 = vmatprep.subr.msk.bf16.mxu0 %vm4951_vm4, %v4505_v51 }
 0x175   : > { %v1135_v53 = vpop.permute.xlu0 %1134  ;;  %v1137_v54 = vpop.permute.xlu1 %1136 }
 0x17a   : > { %4432 = vmatmul.mubr.msk.f32.vlgmr.msra.gmra.mrb[8].mxu0 %vm740_vm3, %v935_v52 }
 0x17b   : > { %4510 = vmatpush3.bf16.xpose.msk.msra.mxu0 %vm4951_vm4, %v4505_v51  ;;  %4445 = vmatprep.mubr.msk.f32.mxu0 %vm740_vm3, %v1135_v53 }
 0x17c   : > { %4469 = vmatprep.subr.bf16.mxu0 %v4778_v3 }
 0x182   : > { %4446 = vmatmul.mubr.msk.f32.vlgmr.msra.gmra.mrb[10].mxu0 %vm740_vm3, %v1137_v54 }
 0x183   : > { %4473 = vmatprep.mubr.msk.bf16.mxu0 %vm4779_vm1, %v4778_v3 }
 0x1d7   : > { %v4419_v57 = vpop.f32.mrb[4].mxu1 }
 0x1d8   : > { %v825_v58 = vadd.f32 %v4419_v57, %v5000_v55  ;;  %v819_v59 = vpop.f32.mrb[5].mxu1 }
 0x1d9   : > { %v820_v60 = vadd.f32 %v819_v59, %v5005_v56 }
 0x1da   : > { %v832_v61 = vsel %vm828_vm5, %v825_v58, -inf }
 0x1db   : > { %833 = vmax.xlane.f32.xlu1 %v832_v61  ;;  %v829_v62 = vsel %vm828_vm5, %v820_v60, -inf }
 0x1dc   : > { %830 = vmax.xlane.f32.xlu0 %v829_v62 }
 0x24d   : > { %v4433_v63 = vpop.f32.mrb[8].mxu0 }
 0x24e   : > { %v1014_v0 = vpop.f32.mrb[9].mxu0  ;;  %v1020_v2 = vadd.f32 %v4433_v63, %v5000_v55 }
 0x24f   : > { %v1015_v1 = vadd.f32 %v1014_v0, %v5005_v56 }
 0x250   : > { %v1026_v6 = vsel %vm828_vm5, %v1020_v2, -inf }
 0x251   : > { %v1023_v4 = vsel %vm828_vm5, %v1015_v1, -inf }
 0x252   : > { %1024 = vmax.xlane.f32.xlu0 %v1023_v4 }
 0x255   : > { %v4447_v5 = vpop.f32.mrb[10].mxu0 }
 0x256   : > { %v1222_v7 = vadd.f32 %v4447_v5, %v5000_v55  ;;  %v1216_v8 = vpop.f32.mrb[11].mxu0  ;;  %1027 = vmax.xlane.f32.xlu0 %v1026_v6 }
 0x257   : > { %v1217_v9 = vadd.f32 %v1216_v8, %v5005_v56 }
 0x258   : > { %v1228_v10 = vsel %vm828_vm5, %v1222_v7, -inf }
 0x259   : > { %v1225_v11 = vsel %vm828_vm5, %v1217_v9, -inf }
 0x25a   : > { %1226 = vmax.xlane.f32.xlu1 %v1225_v11  ;;  %1229 = vmax.xlane.f32.xlu0 %v1228_v10 }
 0x268   : > { %v834_v12 = vpop.xlane.xlu1 %833 }
 0x269   : > { %v836_v17 = vsub.f32 %v825_v58, %v834_v12  ;;  %v831_v20 = vpop.xlane.xlu0 %830 }
 0x26a   : > { %v835_v23 = vsub.f32 %v820_v60, %v831_v20 }
 0x26b   : > { %v839_v19 = vmul.f32 1.442695, %v836_v17  ;;  %4555 = vrot.lane.b32.xlu1 %v5019_v18, %s4781_s4 }
 0x26c   : > { %v837_v24 = vmul.f32 1.442695, %v835_v23 }
 0x26d   : > { %4725 = vpow2.f32 %v839_v19 }
 0x26e   : > { %4727 = vpow2.f32 %v837_v24 }
 0x277   : > { %v4726_v21 = vpop.eup %4725 }
 0x278   : > { %v844_v22 = vsel %vm828_vm5, %v4726_v21, 0.0  ;;  %v4728_v25 = vpop.eup %4727 }
 0x279   : > { %845 = vadd.xlane.f32.xlu0 %v844_v22  ;;  %v841_v27 = vsel %vm828_vm5, %v4728_v25, 0.0 }
 0x28f   : > { %842 = vadd.xlane.f32.xlu1 %v841_v27 }
 0x2df   : > { %v1025_v29 = vpop.xlane.xlu0 %1024 }
 0x2e0   : > { %v1029_v31 = vsub.f32 %v1015_v1, %v1025_v29 }
 0x2e2   : > { %v1031_v32 = vmul.f32 1.442695, %v1029_v31 }
 0x2e3   : > { %v1028_v35 = vpop.xlane.xlu0 %1027 }
 0x2e4   : > { %4729 = vpow2.f32 %v1031_v32  ;;  %v1030_v36 = vsub.f32 %v1020_v2, %v1028_v35 }
 0x2e6   : > { %v1033_v37 = vmul.f32 1.442695, %v1030_v36 }
 0x2e7   : > { %v1227_v38 = vpop.xlane.xlu1 %1226  ;;  %v1230_v39 = vpop.xlane.xlu0 %1229 }
 0x2e8   : > { %4731 = vpow2.f32 %v1033_v37  ;;  %v1232_v40 = vsub.f32 %v1222_v7, %v1230_v39  ;;  %v1231_v52 = vsub.f32 %v1217_v9, %v1227_v38 }
 0x2ea   : > { %v1235_v41 = vmul.f32 1.442695, %v1232_v40  ;;  %v1233_v53 = vmul.f32 1.442695, %v1231_v52 }
 0x2eb   : > { %v4556_v42 = vpop.permute.xlu1 %4555 }
 0x2ec   : > { %v4558_v43 = vunpack.i.h.bf16 %v4556_v42  ;;  %v4557_v44 = vunpack.i.l.bf16 %v4556_v42  ;;  %4733 = vpow2.f32 %v1235_v41 }
 0x2ed   : > { %4735 = vpow2.f32 %v1233_v53 }
 0x2ee   : > { %v4730_v45 = vpop.eup %4729  ;;  %v4501_v46 = vpack.c.bf16 %v4558_v43, %v4557_v44 }
 0x2ef   : > { %v1035_v47 = vsel %vm828_vm5, %v4730_v45, 0.0 }
 0x2f0   : > { %4502 = vmatprep.subr.bf16.mxu1 %v4501_v46  ;;  %1036 = vadd.xlane.f32.xlu1 %v1035_v47 }
 0x2f2   : > { %v4732_v48 = vpop.eup %4731 }
 0x2f3   : > { %v1038_v49 = vsel %vm828_vm5, %v4732_v48, 0.0 }
 0x2f4   : > { %1039 = vadd.xlane.f32.xlu0 %v1038_v49 }
 0x2f6   : > { %v4734_v50 = vpop.eup %4733 }
 0x2f7   : > { %v1240_v51 = vsel %vm828_vm5, %v4734_v50, 0.0  ;;  %v4736_v58 = vpop.eup %4735 }
 0x2f8   : > { %1241 = vadd.xlane.f32.xlu0 %v1240_v51  ;;  %v1237_v59 = vsel %vm828_vm5, %v4736_v58, 0.0 }
 0x301   : > { %4565 = vrot.lane.b32.xlu1 %v4947_v28, %s4782_s20 }
 0x306   : > { %v846_v54 = vpop.xlane.xlu0 %845 }
 0x307   : > { %4737 = vrcp.f32 %v846_v54 }
 0x30e   : > { %4560 = vrot.lane.b32.xlu0 %v5019_v18, %s4780_s3 }
 0x311   : > { %v4738_v60 = vpop.eup %4737 }
 0x312   : > { %1336 = vrot.lane.b32.xlu0 %v4961_v33, %s4782_s20  ;;  %v850_v62 = vmul.f32 %v4738_v60, %v4726_v21 }
 0x31c   : > { %v843_v57 = vpop.xlane.xlu1 %842 }
 0x31d   : > { %4739 = vrcp.f32 %v843_v57 }
 0x325   : > { %1238 = vadd.xlane.f32.xlu1 %v1237_v59 }
 0x327   : > { %v4740_v61 = vpop.eup %4739 }
 0x328   : > { %v849_v28 = vmul.f32 %v4740_v61, %v4728_v25 }
 0x32a   : > { %4424 = vmatprep.mubr.msk.f32.mxu1 %vm828_vm5, %v849_v28 }
 0x32b   : > { %4425 = vmatmul.mubr.msk.f32.vlgmr.msra.gmra.mrb[6].mxu1 %vm828_vm5, %v850_v62  ;;  %v4596_v62 = vld [vmem:[%s4882_s19 + $0x8] sm:$0xff]  }
 0x32c   : > { %4504 = vmatpush3.bf16.msra.mxu1 %v4501_v46 }
 0x336   : > { %1334 = vrot.lane.b32.xlu1 %v4945_v26, %s4782_s20 }
 0x37d   : > { %v1037_v33 = vpop.xlane.xlu1 %1036 }
 0x37e   : > { %4741 = vrcp.f32 %v1037_v33 }
 0x381   : > { %v1040_v63 = vpop.xlane.xlu0 %1039  ;;  %v4566_v2 = vpop.permute.xlu1 %4565 }
 0x382   : > { %4743 = vrcp.f32 %v1040_v63  ;;  %v4568_v6 = vunpack.i.h.bf16 %v4566_v2  ;;  %v4567_v7 = vunpack.i.l.bf16 %v4566_v2 }
 0x384   : > { %v4515_v17 = vpack.c.bf16 %v4568_v6, %v4567_v7 }
 0x385   : > { %v1242_v0 = vpop.xlane.xlu0 %1241 }
 0x386   : > { %4745 = vrcp.f32 %v1242_v0 }
 0x388   : > { %v4742_v1 = vpop.eup %4741 }
 0x389   : > { %v1043_v4 = vmul.f32 %v4742_v1, %v4730_v45  ;;  %v4561_v5 = vpop.permute.xlu0 %4560 }
 0x38a   : > { %v4563_v8 = vunpack.i.h.bf16 %v4561_v5  ;;  %v4562_v9 = vunpack.i.l.bf16 %v4561_v5 }
 0x38b   : > { %4438 = vmatprep.mubr.msk.f32.mxu1 %vm828_vm5, %v1043_v4 }
 0x38c   : > { %v4744_v10 = vpop.eup %4743  ;;  %v4511_v12 = vpack.c.bf16 %v4563_v8, %v4562_v9 }
 0x38d   : > { %v1044_v11 = vmul.f32 %v4744_v10, %v4732_v48  ;;  %v1337_v24 = vpop.permute.xlu0 %1336 }
 0x38e   : > { %4512 = vmatprep.subr.bf16.mxu1 %v4511_v12 }
 0x38f   : > { %4439 = vmatmul.mubr.msk.f32.vlgmr.msra.gmra.mrb[8].mxu1 %vm828_vm5, %v1044_v11 }
 0x390   : > { %4514 = vmatpush3.bf16.msra.mxu1 %v4511_v12  ;;  %v4746_v19 = vpop.eup %4745 }
 0x391   : > { %4517 = vmatprep.subr.msk.bf16.mxu1 %vm4951_vm4, %v4515_v17  ;;  %v1246_v22 = vmul.f32 %v4746_v19, %v4734_v50 }
 0x3b2   : > { %v1239_v26 = vpop.xlane.xlu1 %1238 }
 0x3b3   : > { %4747 = vrcp.f32 %v1239_v26 }
 0x3b6   : > { %v1335_v23 = vpop.permute.xlu1 %1334 }
 0x3bd   : > { %v4748_v20 = vpop.eup %4747 }
 0x3be   : > { %v1245_v21 = vmul.f32 %v4748_v20, %v4736_v58 }
 0x3c0   : > { %4452 = vmatprep.mubr.msk.f32.mxu1 %vm828_vm5, %v1245_v21  ;;  %v5074_v21 = vsub.s32 3, %v4930_v13 }
 0x3c1   : > { %4453 = vmatmul.mubr.msk.f32.vlgmr.msra.gmra.mrb[10].mxu1 %vm828_vm5, %v1246_v22 }
 0x3c2   : > { %4520 = vmatpush3.bf16.xpose.msk.msra.mxu1 %vm4951_vm4, %v4515_v17  ;;  %4459 = vmatprep.mubr.msk.f32.mxu1 %vm740_vm3, %v1335_v23  ;;  %v1573_v22 = vrot.slane %v4936_v15, %v5074_v21 }
 0x3c9   : > { %4460 = vmatmul.mubr.msk.f32.vlgmr.msra.gmra.mrb[12].mxu1 %vm740_vm3, %v1337_v24 }
 0x3fe   : > { %v5049_v25 = vpop.f32.mrb[6].mxu1 }
 0x3ff   : > { %v5051_v27 = vpop.f32.mrb[7].mxu1 }
 0x462   : > { %v4440_v29 = vpop.f32.mrb[8].mxu1 }
 0x463   : > { %v1125_v31 = vpop.f32.mrb[9].mxu1 }
 0x464   : > { %v4574_v32 = vpack.i.bf16 %v4440_v29, %v1125_v31 }
 0x494   : > { %v4454_v35 = vpop.f32.mrb[10].mxu1 }
 0x495   : > { %v1325_v36 = vpop.f32.mrb[11].mxu1 }
 0x496   : > { %v4579_v37 = vpack.i.bf16 %v4454_v35, %v1325_v36 }
 0x49c   : > { %v4461_v38 = vpop.f32.mrb[12].mxu1 }
 0x49d   : > { %v1422_v39 = vadd.f32 %v4461_v38, %v5000_v55  ;;  %v1416_v30 = vpop.f32.mrb[13].mxu1 }
 0x49e   : > { %v1417_v40 = vadd.f32 %v1416_v30, %v5005_v56 }
 0x49f   : > { %v1428_v41 = vsel %vm828_vm5, %v1422_v39, -inf }
 0x4a0   : > { %1429 = vmax.xlane.f32.xlu0 %v1428_v41  ;;  %v1425_v42 = vsel %vm828_vm5, %v1417_v40, -inf }
 0x4a1   : > { %1426 = vmax.xlane.f32.xlu1 %v1425_v42 }
 0x52d   : > { %v1430_v43 = vpop.xlane.xlu0 %1429 }
 0x52e   : > { %v1432_v44 = vsub.f32 %v1422_v39, %v1430_v43  ;;  %v1427_v45 = vpop.xlane.xlu1 %1426 }
 0x52f   : > { %v1431_v46 = vsub.f32 %v1417_v40, %v1427_v45 }
 0x530   : > { %v1435_v47 = vmul.f32 1.442695, %v1432_v44 }
 0x531   : > { %v1433_v48 = vmul.f32 1.442695, %v1431_v46 }
 0x532   : > { %4749 = vpow2.f32 %v1435_v47 }
 0x533   : > { %4751 = vpow2.f32 %v1433_v48 }
 0x53c   : > { %v4750_v49 = vpop.eup %4749 }
 0x53d   : > { %v4752_v50 = vpop.eup %4751  ;;  %v1440_v55 = vsel %vm828_vm5, %v4750_v49, 0.0 }
 0x53e   : > { %1441 = vadd.xlane.f32.xlu1 %v1440_v55  ;;  %v1437_v56 = vsel %vm828_vm5, %v4752_v50, 0.0  ;;  %v1673_v55 = vld [vmem:[%s4887_s26 + $0x8] sm:$0xff] }
 0x53f   : > { %1438 = vadd.xlane.f32.xlu0 %v1437_v56 }
 0x54f   : > { %4575 = vrot.lane.b32.xlu1 %v4574_v32, %s4783_s27  ;;  %v4765_v32 = vld [vmem:[#allocation2] sm:$0xff] }
 0x553   : > { %4580 = vrot.lane.b32.xlu1 %v4579_v37, %s4784_s30  ;;  %v4766_v37 = vld [vmem:[#allocation2 + $0x8] sm:$0xff] }
 0x555   : > { %4570 = vrot.lane.b32.xlu0 %v5019_v18, %s4782_s20  ;;  %v4595_v18 = vld [vmem:[%s4882_s19] sm:$0xff]  }
 0x556   : > { %4470 = vmatpush3.bf16.msra.mxu0 %v4595_v18 }
 0x557   : > { %4471 = vmatprep.subr.bf16.mxu0 %v4778_v3 }
 0x55a   : > { %4472 = vmatpush3.bf16.msra.mxu0 %v4596_v62 }
 0x5cb   : > { %v1442_v51 = vpop.xlane.xlu1 %1441 }
 0x5cc   : > { %4753 = vrcp.f32 %v1442_v51  ;;  %v1439_v52 = vpop.xlane.xlu0 %1438  ;;  %v1681_v51 = vld [vmem:[%s4887_s26 + $0x48] sm:$0xff] }
 0x5cd   : > { %4755 = vrcp.f32 %v1439_v52 }
 0x5cf   : > { %v4576_v1 = vpop.permute.xlu1 %4575 }
 0x5d0   : > { %v4571_v53 = vpop.permute.xlu0 %4570  ;;  %v4578_v4 = vunpack.i.h.bf16 %v4576_v1  ;;  %v4577_v5 = vunpack.i.l.bf16 %v4576_v1 }
 0x5d1   : > { %v4573_v54 = vunpack.i.h.bf16 %v4571_v53  ;;  %v4572_v57 = vunpack.i.l.bf16 %v4571_v53  ;;  %v3985_v53 = vcombine.low %v1673_v55, %v1681_v51 }
 0x5d2   : > { %v1559_v9 = vsel %vm740_vm3, %v5049_v25, %v4578_v4  ;;  %v1558_v3 = vsel %vm740_vm3, %v5051_v27, %v4577_v5  ;;  %v4786_v4 = vmov 0  }
 0x5d3   : > { %v4521_v58 = vpack.c.bf16 %v4573_v54, %v4572_v57  ;;  %v4581_v2 = vpop.permute.xlu1 %4580  ;;  %v3986_v54 = vcombine.high %v1673_v55, %v1681_v51  ;;  %v1688_v57 = vld [vmem:[%s4887_s26 + $0x80] sm:$0xff]  ;;  %v1701_v55 = vld [vmem:[%s4887_s26 + $0xe8] sm:$0xff] }
 0x5d4   : > { %v4583_v6 = vunpack.i.h.bf16 %v4581_v2  ;;  %v4582_v7 = vunpack.i.l.bf16 %v4581_v2  ;;  %v1683_v2 = vld [vmem:[%s4887_s26 + $0x58] sm:$0xff] }
 0x5d5   : > { %4522 = vmatprep.subr.bf16.mxu1 %v4521_v58  ;;  %1994 = vmatprep.subr.bf16.mxu0 %v3986_v54  ;;  %v1678_v54 = vld [vmem:[%s4887_s26 + $0x30] sm:$0xff] }
 0x5d6   : > { %v4754_v59 = vpop.eup %4753  ;;  %4524 = vmatpush3.bf16.msra.mxu1 %v4521_v58  ;;  %v1560_v12 = vsel %vm828_vm5, %v1558_v3, %v4582_v7  ;;  %v1561_v17 = vsel %vm828_vm5, %v1559_v9, %v4583_v6  ;;  %v1696_v58 = vld [vmem:[%s4887_s26 + $0xc0] sm:$0xff] }
 0x5d7   : > { %v4756_v60 = vpop.eup %4755  ;;  %v1446_v28 = vmul.f32 %v4754_v59, %v4750_v49  ;;  %v1672_v49 = vld [vmem:[%s4887_s26] sm:$0xff]  ;;  %v1689_v59 = vld [vmem:[%s4887_s26 + $0x88] sm:$0xff] }
 0x5d8   : > { %v1445_v61 = vmul.f32 %v4756_v60, %v4752_v50  ;;  %v1680_v50 = vld [vmem:[%s4887_s26 + $0x40] sm:$0xff]  ;;  %v4000_v60 = vcombine.high %v1688_v57, %v1696_v58 }
 0x5d9   : > { %v3984_v56 = vcombine.high %v1672_v49, %v1680_v50  ;;  %v3983_v52 = vcombine.low %v1672_v49, %v1680_v50  ;;  %v1700_v49 = vld [vmem:[%s4887_s26 + $0xe0] sm:$0xff]  ;;  %v1693_v50 = vld [vmem:[%s4887_s26 + $0xa8] sm:$0xff] }
 0x5da   : > { %4466 = vmatprep.mubr.msk.f32.mxu1 %vm828_vm5, %v1445_v61  ;;  %v1697_v61 = vld [vmem:[%s4887_s26 + $0xc8] sm:$0xff] }
 0x5db   : > { %4467 = vmatmul.mubr.msk.f32.vlgmr.msra.gmra.mrb[14].mxu1 %vm828_vm5, %v1446_v28  ;;  %1951 = vmatprep.subr.bf16.mxu1 %v3984_v56  ;;  %v3999_v28 = vcombine.low %v1688_v57, %v1696_v58  ;;  %v4001_v18 = vcombine.low %v1689_v59, %v1697_v61  ;;  %v4002_v62 = vcombine.high %v1689_v59, %v1697_v61  ;;  %v1686_v57 = vld [vmem:[%s4887_s26 + $0x70] sm:$0xff]  ;;  %v1679_v58 = vld [vmem:[%s4887_s26 + $0x38] sm:$0xff] }
 0x5dc   : > { %1952 = vmatpush1.bf16.msra.mxu1 %v3983_v52  ;;  %1983 = vmatprep.mubr.bf16.mxu1 %v4786_v4  ;;  %v1687_v59 = vld [vmem:[%s4887_s26 + $0x78] sm:$0xff]  ;;  %v4009_v61 = vcombine.low %v1693_v50, %v1701_v55 }
 0x5dd   : > { %1953 = vmatprep.subr.bf16.mxu1 %v4000_v60 }
 0x5e0   : > { %1954 = vmatpush1.bf16.msra.mxu1 %v3999_v28  ;;  %v3996_v28 = vcombine.high %v1678_v54, %v1686_v57 }
 0x6ae   : > { %v4468_v33 = vpop.f32.mrb[14].mxu1 }
 0x6af   : > { %v1525_v63 = vpop.f32.mrb[15].mxu1 }
 0x6b0   : > { %v4584_v0 = vpack.i.bf16 %v4468_v33, %v1525_v63  ;;  %v1674_v33 = vld [vmem:[%s4887_s26 + $0x10] sm:$0xff] }
 0x6b1   : > { %v1682_v63 = vld [vmem:[%s4887_s26 + $0x50] sm:$0xff] }
 0x6b2   : > { %4585 = vrot.lane.b32.xlu0 %v4584_v0, %s4785_s14  ;;  %v1675_v0 = vld [vmem:[%s4887_s26 + $0x18] sm:$0xff]  ;;  %v3988_v1 = vcombine.high %v1674_v33, %v1682_v63  ;;  %v3987_v5 = vcombine.low %v1674_v33, %v1682_v63  ;;  %v1702_v33 = vld [vmem:[%s4887_s26 + $0xf0] sm:$0xff] }
 0x6b3   : > { %v3989_v6 = vcombine.low %v1675_v0, %v1683_v2  ;;  %v3990_v7 = vcombine.high %v1675_v0, %v1683_v2  ;;  %v1695_v63 = vld [vmem:[%s4887_s26 + $0xb8] sm:$0xff]  ;;  %v3997_v2 = vcombine.low %v1679_v58, %v1687_v59 }
 0x6b4   : > { %2037 = vmatprep.subr.bf16.mxu1 %v3988_v1  ;;  %v1703_v0 = vld [vmem:[%s4887_s26 + $0xf8] sm:$0xff]  ;;  %v3995_v1 = vcombine.low %v1678_v54, %v1686_v57 }
 0x724   : > { %v4586_v8 = vpop.permute.xlu0 %4585 }
 0x725   : > { %v4588_v10 = vunpack.i.h.bf16 %v4586_v8  ;;  %v4587_v11 = vunpack.i.l.bf16 %v4586_v8 }
 0x727   : > { %v1563_v26 = vsel %vm1562_vm6, %v1560_v12, %v4587_v11  ;;  %v1564_v19 = vsel %vm1562_vm6, %v1561_v17, %v4588_v10  ;;  %v5097_v17 = vsub.s32 4, %v4930_v13 }
 0x728   : > { %v1565_v20 = vpack.c.bf16 %v1564_v19, %v1563_v26  ;;  %v5102_v19 = vsub.s32 5, %v4930_v13 }
 0x729   : > { %v1662_v26 = vrot.slane %v4936_v15, %v5097_v17 }
 0x72a   : > { %4474 = vmatmul.mubr.msk.bf16.vlgmr.msra.gmra.mrb[12].mxu0 %vm571_vm2, %v1565_v20 }
 0x72b   : > { %1995 = vmatpush1.bf16.msra.mxu0 %v3985_v53  ;;  %2026 = vmatprep.mubr.bf16.mxu0 %v4786_v4  ;;  %v4010_v53 = vcombine.high %v1693_v50, %v1701_v55  ;;  %v4628_v50 = vld [vmem:[%s4902_s18 + $0xb8] sm:$0xff]   ;;  %v4629_v55 = vld [vmem:[%s4902_s18 + $0x140] sm:$0xff]  }
 0x72c   : > { %1996 = vmatprep.subr.bf16.mxu0 %v4002_v62  ;;  %v1694_v62 = vld [vmem:[%s4887_s26 + $0xb0] sm:$0xff] }
 0x72f   : > { %1997 = vmatpush1.bf16.msra.mxu0 %v4001_v18  ;;  %v3998_v18 = vcombine.high %v1679_v58, %v1687_v59  ;;  %v5196_v58 = vsub.s32 6, %v4930_v13 }
 0x730   : > { %2080 = vmatprep.subr.bf16.mxu0 %v3990_v7  ;;  %v4011_v7 = vcombine.low %v1694_v62, %v1702_v33 }
 0x7fd   : > { %v1623_v23 = vpop.f32.mrb[12].mxu0 }
 0x7fe   : > { %v1624_v24 = vadd.f32 %v1623_v23, %v1573_v22  ;;  %v4475_v25 = vpop.f32.mrb[13].mxu0 }
 0x7ff   : > { %v1626_v27 = vpop.f32.mrb[14].mxu0 }
 0x800   : > { %v1627_v29 = vadd.f32 %v1626_v27, %v1573_v22  ;;  %v4476_v31 = vpop.f32.mrb[15].mxu0  ;;  %v1630_v35 = vadd.f32 %v4765_v32, %v1624_v24  ;;  %v1668_v24 = vrot.slane %v4936_v15, %v5102_v19  ;;  %v1698_v32 = vld [vmem:[%s4887_s26 + $0xd0] sm:$0xff]  ;;  %v1676_v15 = vld [vmem:[%s4887_s26 + $0x20] sm:$0xff] }
 0x801   : > { %v1690_v31 = vld [vmem:[%s4887_s26 + $0x90] sm:$0xff] }
 0x802   : > { %v1632_v36 = vsel %vm571_vm2, %v1630_v35, 0.0  ;;  %v1631_v38 = vadd.f32 %v4766_v37, %v1627_v29 }
 0x803   : > { %1633 = vadd.xlane.f32.xlu1 %v1632_v36  ;;  %v1699_v36 = vld [vmem:[%s4887_s26 + $0xd8] sm:$0xff] }
 0x804   : > { %v1635_v39 = vsel %vm571_vm2, %v1631_v38, 0.0 }
 0x805   : > { %1636 = vadd.xlane.f32.xlu0 %v1635_v39 }
 0x890   : > { %v1634_v30 = vpop.xlane.xlu1 %1633 }
 0x891   : > { %v1639_v40 = vmul.f32 0.03125, %v1634_v30  ;;  %v4004_v30 = vcombine.high %v1690_v31, %v1698_v32 }
 0x892   : > { %v1637_v41 = vpop.xlane.xlu0 %1636 }
 0x893   : > { %v1641_v42 = vsub.f32 %v1630_v35, %v1639_v40  ;;  %v1640_v43 = vmul.f32 0.03125, %v1637_v41  ;;  %v1691_v35 = vld [vmem:[%s4887_s26 + $0x98] sm:$0xff]  ;;  %v1684_v41 = vld [vmem:[%s4887_s26 + $0x60] sm:$0xff] }
 0x894   : > { %v4006_v40 = vcombine.high %v1691_v35, %v1699_v36  ;;  %v3991_v56 = vcombine.low %v1676_v15, %v1684_v41 }
 0x895   : > { %v1642_v44 = vsub.f32 %v1631_v38, %v1640_v43  ;;  %v1643_v45 = vmul.f32 %v1641_v42, %v1641_v42  ;;  %v1685_v43 = vld [vmem:[%s4887_s26 + $0x68] sm:$0xff] }
 0x897   : > { %v1645_v46 = vsel %vm571_vm2, %v1643_v45, 0.0  ;;  %v1644_v47 = vmul.f32 %v1642_v44, %v1642_v44  ;;  %v4005_v45 = vcombine.low %v1691_v35, %v1699_v36  ;;  %v4613_v35 = vld [vmem:[%s4902_s18 + $0x60] sm:$0xff]  }
 0x898   : > { %1646 = vadd.xlane.f32.xlu0 %v1645_v46  ;;  %v3992_v46 = vcombine.high %v1676_v15, %v1684_v41  ;;  %v4614_v36 = vld [vmem:[%s4902_s18 + $0xe0] sm:$0xff]   ;;  %v4618_v15 = vld [vmem:[%s4902_s18 + $0xe8] sm:$0xff]  }
 0x899   : > { %v1648_v48 = vsel %vm571_vm2, %v1644_v47, 0.0  ;;  %v4619_v41 = vld [vmem:[%s4902_s18 + $0x28] sm:$0xff]  }
 0x89a   : > { %1649 = vadd.xlane.f32.xlu1 %v1648_v48  ;;  %v1692_v48 = vld [vmem:[%s4887_s26 + $0xa0] sm:$0xff] }
 0x89b   : > { %v4008_v52 = vcombine.high %v1692_v48, %v1700_v49  ;;  %v4007_v60 = vcombine.low %v1692_v48, %v1700_v49  ;;  %v4626_v48 = vld [vmem:[%s4902_s18 + $0xf8] sm:$0xff]  }
 0x89c   : > { %v4627_v49 = vld [vmem:[%s4902_s18 + $0x38] sm:$0xff]  }
 0x925   : > { %v1647_v8 = vpop.xlane.xlu0 %1646 }
 0x926   : > { %v1651_v9 = vmul.f32 0.03125, %v1647_v8  ;;  %v4013_v8 = vcombine.low %v1695_v63, %v1703_v0 }
 0x927   : > { %v1650_v3 = vpop.xlane.xlu1 %1649 }
 0x928   : > { %v1653_v10 = vadd.f32 1e-05, %v1651_v9  ;;  %v1652_v11 = vmul.f32 0.03125, %v1650_v3  ;;  %v4597_v9 = vld [vmem:[%s4902_s18 + $0x40] sm:$0xff]  }
 0x929   : > { %v4598_v3 = vld [vmem:[%s4902_s18 + $0xc0] sm:$0xff]  }
 0x92a   : > { %4757 = vrsqrt.f32 %v1653_v10  ;;  %v1654_v12 = vadd.f32 1e-05, %v1652_v11  ;;  %v4599_v10 = vld [vmem:[%s4902_s18] sm:$0xff]  }
 0x92b   : > { %v4600_v11 = vld [vmem:[%s4902_s18 + $0x80] sm:$0xff]  }
 0x92c   : > { %4759 = vrsqrt.f32 %v1654_v12  ;;  %v4601_v12 = vld [vmem:[%s4902_s18 + $0x48] sm:$0xff]  }
 0x934   : > { %v4758_v20 = vpop.eup %4757 }
 0x935   : > { %v1657_v22 = vmul.f32 %v4758_v20, %v1641_v42  ;;  %v1677_v42 = vld [vmem:[%s4887_s26 + $0x28] sm:$0xff] }
 0x936   : > { %v4760_v23 = vpop.eup %4759  ;;  %v3994_v47 = vcombine.high %v1677_v42, %v1685_v43  ;;  %v3993_v51 = vcombine.low %v1677_v42, %v1685_v43  ;;  %v4604_v20 = vld [vmem:[%s4902_s18 + $0x88] sm:$0xff]   ;;  %v4621_v43 = vld [vmem:[%s4902_s18 + $0x70] sm:$0xff]  }
 0x937   : > { %v1663_v25 = vmul.f32 %v1662_v26, %v1657_v22  ;;  %v1658_v27 = vmul.f32 %v4760_v23, %v1642_v44  ;;  %v4003_v44 = vcombine.low %v1690_v31, %v1698_v32  ;;  %v4605_v22 = vld [vmem:[%s4902_s18 + $0x50] sm:$0xff]   ;;  %v4611_v31 = vld [vmem:[%s4902_s18 + $0x18] sm:$0xff]   ;;  %v4620_v42 = vld [vmem:[%s4902_s18 + $0xa8] sm:$0xff]  }
 0x938   : > { %v4606_v23 = vld [vmem:[%s4902_s18 + $0xd0] sm:$0xff]   ;;  %v4612_v32 = vld [vmem:[%s4902_s18 + $0x98] sm:$0xff]  }
 0x939   : > { %v1664_v29 = vmul.f32 %v1662_v26, %v1658_v27  ;;  %v5110_v37 = vadd.f32 %v1668_v24, %v1663_v25  ;;  %v4602_v26 = vld [vmem:[%s4902_s18 + $0xc8] sm:$0xff]   ;;  %v4608_v25 = vld [vmem:[%s4902_s18 + $0x90] sm:$0xff]   ;;  %v4609_v27 = vld [vmem:[%s4902_s18 + $0x58] sm:$0xff]  }
 0x93b   : > { %v5112_v38 = vadd.f32 %v1668_v24, %v1664_v29  ;;  %v4607_v24 = vld [vmem:[%s4902_s18 + $0x10] sm:$0xff]   ;;  %v4610_v29 = vld [vmem:[%s4902_s18 + $0xd8] sm:$0xff]  }
 0x93d   : > { %v5116_v39 = vpack.c.bf16 %v5112_v38, %v5110_v37 }
 0x93f   : > { %4015 = vmatmul.mubr.msk.bf16.vlgmr.msra.gmra.mrb[16].mxu1 %vm571_vm2, %v5116_v39  ;;  %4016 = vmatmul.mubr.msk.bf16.vlgmr.msra.gmra.mrb[16].mxu0 %vm571_vm2, %v5116_v39 }
 0x940   : > { %2038 = vmatpush1.bf16.msra.mxu1 %v3987_v5  ;;  %2081 = vmatpush1.bf16.msra.mxu0 %v3989_v6  ;;  %v4012_v5 = vcombine.high %v1694_v62, %v1702_v33  ;;  %v4014_v6 = vcombine.high %v1695_v63, %v1703_v0 }
 0x941   : > { %2039 = vmatprep.subr.bf16.mxu1 %v4004_v30  ;;  %2082 = vmatprep.subr.bf16.mxu0 %v4006_v40  ;;  %v4616_v30 = vld [vmem:[%s4902_s18 + $0xa0] sm:$0xff]   ;;  %v4617_v40 = vld [vmem:[%s4902_s18 + $0x68] sm:$0xff]  }
 0x942   : > { %2069 = vmatprep.mubr.bf16.mxu1 %v4786_v4  ;;  %2112 = vmatprep.mubr.bf16.mxu0 %v4786_v4 }
 0x944   : > { %2040 = vmatpush1.bf16.msra.mxu1 %v4003_v44  ;;  %2083 = vmatpush1.bf16.msra.mxu0 %v4005_v45  ;;  %v4622_v44 = vld [vmem:[%s4902_s18 + $0xf0] sm:$0xff]  }
 0x945   : > { %2123 = vmatprep.subr.bf16.mxu1 %v3992_v46  ;;  %2166 = vmatprep.subr.bf16.mxu0 %v3994_v47  ;;  %v4623_v45 = vld [vmem:[%s4902_s18 + $0x30] sm:$0xff]   ;;  %v4625_v47 = vld [vmem:[%s4902_s18 + $0x78] sm:$0xff]  }
 0x946   : > { %v4624_v46 = vld [vmem:[%s4902_s18 + $0xb0] sm:$0xff]  }
 0x947   : > { %4017 = vmatmul.mubr.msk.bf16.vlgmr.msra.gmra.mrb[20].mxu1 %vm571_vm2, %v5116_v39  ;;  %4018 = vmatmul.mubr.msk.bf16.vlgmr.msra.gmra.mrb[20].mxu0 %vm571_vm2, %v5116_v39 }
 0x948   : > { %2124 = vmatpush1.bf16.msra.mxu1 %v3991_v56  ;;  %2167 = vmatpush1.bf16.msra.mxu0 %v3993_v51  ;;  %v4630_v56 = vld [vmem:[%s4902_s18 + $0x1c0] sm:$0xff]  }
 0x949   : > { %2125 = vmatprep.subr.bf16.mxu1 %v4008_v52  ;;  %2168 = vmatprep.subr.bf16.mxu0 %v4010_v53  ;;  %v1704_v51 = vld [vmem:[%s4892_s29] sm:$0xff] }
 0x94a   : > { %2155 = vmatprep.mubr.bf16.mxu1 %v4786_v4  ;;  %2198 = vmatprep.mubr.bf16.mxu0 %v4786_v4  ;;  %v1711_v52 = vrot.slane %v1704_v51, %v4939_v16  ;;  %v1719_v53 = vrot.slane %v1704_v51, %v4978_v34  ;;  %v1715_v54 = vrot.slane %v1704_v51, %v4933_v14 }
 0x94b   : > { %v1723_v57 = vrot.slane %v1704_v51, %v5074_v21 }
 0x94c   : > { %2126 = vmatpush1.bf16.msra.mxu1 %v4007_v60  ;;  %2169 = vmatpush1.bf16.msra.mxu0 %v4009_v61  ;;  %v5199_v61 = vsub.s32 7, %v4930_v13 }
 0x94d   : > { %2209 = vmatprep.subr.bf16.mxu1 %v3996_v28  ;;  %2252 = vmatprep.subr.bf16.mxu0 %v3998_v18 }
 0x94f   : > { %4019 = vmatmul.mubr.msk.bf16.vlgmr.msra.gmra.mrb[24].mxu1 %vm571_vm2, %v5116_v39  ;;  %4020 = vmatmul.mubr.msk.bf16.vlgmr.msra.gmra.mrb[24].mxu0 %vm571_vm2, %v5116_v39 }
 0x950   : > { %2210 = vmatpush1.bf16.msra.mxu1 %v3995_v1  ;;  %2253 = vmatpush1.bf16.msra.mxu0 %v3997_v2 }
 0x951   : > { %2211 = vmatprep.subr.bf16.mxu1 %v4012_v5  ;;  %2254 = vmatprep.subr.bf16.mxu0 %v4014_v6 }
 0x952   : > { %2241 = vmatprep.mubr.bf16.mxu1 %v4786_v4  ;;  %2284 = vmatprep.mubr.bf16.mxu0 %v4786_v4  ;;  %v4603_v4 = vld [vmem:[%s4902_s18 + $0x8] sm:$0xff]  }
 0x954   : > { %2212 = vmatpush1.bf16.msra.mxu1 %v4011_v7  ;;  %2255 = vmatpush1.bf16.msra.mxu0 %v4013_v8 }
 0x955   : > { %4210 = vmatprep.subr.bf16.mxu1 %v4597_v9  ;;  %4232 = vmatprep.subr.bf16.mxu0 %v4598_v3  ;;  %v1727_v9 = vrot.slane %v1704_v51, %v5097_v17  ;;  %v1735_v3 = vrot.slane %v1704_v51, %v5196_v58 }
 0x957   : > { %4021 = vmatmul.mubr.msk.bf16.vlgmr.msra.gmra.mrb[28].mxu1 %vm571_vm2, %v5116_v39  ;;  %4022 = vmatmul.mubr.msk.bf16.vlgmr.msra.gmra.mrb[28].mxu0 %vm571_vm2, %v5116_v39  ;;  %v4615_v39 = vld [vmem:[%s4902_s18 + $0x20] sm:$0xff]  }
 0x958   : > { %4211 = vmatpush3.bf16.msra.mxu1 %v4599_v10  ;;  %4233 = vmatpush3.bf16.msra.mxu0 %v4600_v11  ;;  %v1731_v11 = vrot.slane %v1704_v51, %v5102_v19 }
 0x959   : > { %4212 = vmatprep.subr.bf16.mxu1 %v4601_v12  ;;  %4234 = vmatprep.subr.bf16.mxu0 %v4602_v26  ;;  %v1739_v12 = vrot.slane %v1704_v51, %v5199_v61 }
 0x95c   : > { %4213 = vmatpush3.bf16.msra.mxu1 %v4603_v4  ;;  %4235 = vmatpush3.bf16.msra.mxu0 %v4604_v20 }
 0x95d   : > { %4214 = vmatprep.subr.bf16.mxu1 %v4605_v22  ;;  %4236 = vmatprep.subr.bf16.mxu0 %v4606_v23 }
 0x960   : > { %4215 = vmatpush3.bf16.msra.mxu1 %v4607_v24  ;;  %4237 = vmatpush3.bf16.msra.mxu0 %v4608_v25 }
 0x961   : > { %4216 = vmatprep.subr.bf16.mxu1 %v4609_v27  ;;  %4238 = vmatprep.subr.bf16.mxu0 %v4610_v29  ;;  %v5206_v29 = vld [vmem:[%s4892_s29 + $0x8] sm:$0xff] }
 0x964   : > { %4217 = vmatpush3.bf16.msra.mxu1 %v4611_v31  ;;  %4239 = vmatpush3.bf16.msra.mxu0 %v4612_v32 }
 0x965   : > { %4218 = vmatprep.subr.bf16.mxu1 %v4613_v35  ;;  %4240 = vmatprep.subr.bf16.mxu0 %v4614_v36 }
 0x968   : > { %4219 = vmatpush3.bf16.msra.mxu1 %v4615_v39  ;;  %4241 = vmatpush3.bf16.msra.mxu0 %v4616_v30 }
 0x969   : > { %4220 = vmatprep.subr.bf16.mxu1 %v4617_v40  ;;  %4242 = vmatprep.subr.bf16.mxu0 %v4618_v15  ;;  %v4631_v40 = vld [vmem:[%s4902_s18 + $0x100] sm:$0xff]  }
 0x96a   : > { %v4632_v15 = vld [vmem:[%s4902_s18 + $0x180] sm:$0xff]  }
 0x96c   : > { %4221 = vmatpush3.bf16.msra.mxu1 %v4619_v41  ;;  %4243 = vmatpush3.bf16.msra.mxu0 %v4620_v42 }
 0x96d   : > { %4222 = vmatprep.subr.bf16.mxu1 %v4621_v43  ;;  %4244 = vmatprep.subr.bf16.mxu0 %v4622_v44 }
 0x970   : > { %4223 = vmatpush3.bf16.msra.mxu1 %v4623_v45  ;;  %4245 = vmatpush3.bf16.msra.mxu0 %v4624_v46  ;;  %v4633_v45 = vld [vmem:[%s4902_s18 + $0x148] sm:$0xff]  }
 0x971   : > { %4224 = vmatprep.subr.bf16.mxu1 %v4625_v47  ;;  %4246 = vmatprep.subr.bf16.mxu0 %v4626_v48  ;;  %v4634_v46 = vld [vmem:[%s4902_s18 + $0x1c8] sm:$0xff]   ;;  %v1743_v47 = vrot.slane %v5206_v29, %v4939_v16  ;;  %v1747_v16 = vrot.slane %v5206_v29, %v4933_v14 }
 0x974   : > { %4225 = vmatpush3.bf16.msra.mxu1 %v4627_v49  ;;  %4247 = vmatpush3.bf16.msra.mxu0 %v4628_v50 }
 0x975   : > { %4254 = vmatprep.subr.bf16.mxu1 %v4629_v55  ;;  %4276 = vmatprep.subr.bf16.mxu0 %v4630_v56  ;;  %v1751_v56 = vrot.slane %v5206_v29, %v4978_v34  ;;  %v1755_v34 = vrot.slane %v5206_v29, %v5074_v21 }
 0xa12   : > { %v1985_v59 = vpop.f32.mrb[16].mxu1  ;;  %v2028_v60 = vpop.f32.mrb[16].mxu0 }
 0xa13   : > { %v1986_v28 = vadd.f32 %v1985_v59, %v1711_v52  ;;  %v2029_v18 = vadd.f32 %v2028_v60, %v1719_v53  ;;  %v1987_v62 = vpop.f32.mrb[17].mxu1  ;;  %v2030_v33 = vpop.f32.mrb[17].mxu0  ;;  %v4635_v60 = vld [vmem:[%s4902_s18 + $0x108] sm:$0xff]  }
 0xa14   : > { %v1988_v63 = vadd.f32 %v1987_v62, %v1715_v54  ;;  %v2031_v0 = vadd.f32 %v2030_v33, %v1723_v57  ;;  %v1989_v1 = vpop.f32.mrb[18].mxu1  ;;  %v2032_v2 = vpop.f32.mrb[18].mxu0 }
 0xa15   : > { %v1990_v5 = vadd.f32 %v1989_v1, %v1711_v52  ;;  %v2033_v6 = vadd.f32 %v2032_v2, %v1719_v53  ;;  %v1991_v7 = vpop.f32.mrb[19].mxu1  ;;  %v2034_v8 = vpop.f32.mrb[19].mxu0  ;;  %v2295_v26 = vmax.f32 %v1986_v28, 0.0  ;;  %v2297_v4 = vmax.f32 %v2029_v18, 0.0  ;;  %v4636_v28 = vld [vmem:[%s4902_s18 + $0x188] sm:$0xff]   ;;  %v4638_v1 = vld [vmem:[%s4902_s18 + $0x1d0] sm:$0xff]  }
 0xa16   : > { %v1992_v10 = vadd.f32 %v1991_v7, %v1715_v54  ;;  %v2035_v13 = vadd.f32 %v2034_v8, %v1723_v57  ;;  %v2296_v23 = vmax.f32 %v1988_v63, 0.0  ;;  %v2298_v24 = vmax.f32 %v2031_v0, 0.0  ;;  %v4637_v0 = vld [vmem:[%s4902_s18 + $0x150] sm:$0xff]  }
 0xa17   : > { %v2311_v20 = vmax.f32 %v1990_v5, 0.0  ;;  %v2313_v22 = vmax.f32 %v2033_v6, 0.0 }
 0xa18   : > { %v2312_v25 = vmax.f32 %v1992_v10, 0.0  ;;  %v2314_v27 = vmax.f32 %v2035_v13, 0.0  ;;  %v4639_v13 = vld [vmem:[%s4902_s18 + $0x110] sm:$0xff]  }
 0xa19   : > { %v2327_v31 = vpack.c.bf16 %v2311_v20, %v2295_v26  ;;  %v2329_v32 = vpack.c.bf16 %v2313_v22, %v2297_v4  ;;  %v4641_v22 = vld [vmem:[%s4902_s18 + $0x158] sm:$0xff]  }
 0xa1a   : > { %v2328_v35 = vpack.c.bf16 %v2312_v25, %v2296_v23  ;;  %v2330_v36 = vpack.c.bf16 %v2314_v27, %v2298_v24  ;;  %v2071_v39 = vpop.f32.mrb[20].mxu1  ;;  %v2114_v30 = vpop.f32.mrb[20].mxu0  ;;  %v4642_v23 = vld [vmem:[%s4902_s18 + $0x1d8] sm:$0xff]  }
 0xa1b   : > { %v2072_v41 = vadd.f32 %v2071_v39, %v1727_v9  ;;  %v2115_v42 = vadd.f32 %v2114_v30, %v1735_v3  ;;  %v2073_v43 = vpop.f32.mrb[21].mxu1  ;;  %v2116_v44 = vpop.f32.mrb[21].mxu0 }
 0xa1c   : > { %v2074_v48 = vadd.f32 %v2073_v43, %v1731_v11  ;;  %v2117_v49 = vadd.f32 %v2116_v44, %v1739_v12  ;;  %v2075_v50 = vpop.f32.mrb[22].mxu1  ;;  %v2118_v55 = vpop.f32.mrb[22].mxu0  ;;  %3403 = vmatprep.mubr.bf16.mxu1 %v2328_v35  ;;  %3444 = vmatprep.mubr.bf16.mxu0 %v2330_v36  ;;  %v4643_v43 = vld [vmem:[%s4902_s18 + $0x118] sm:$0xff]  }
 0xa1d   : > { %v2076_v51 = vadd.f32 %v2075_v50, %v1727_v9  ;;  %v2119_v52 = vadd.f32 %v2118_v55, %v1735_v3  ;;  %v2077_v53 = vpop.f32.mrb[23].mxu1  ;;  %v2120_v54 = vpop.f32.mrb[23].mxu0  ;;  %3404 = vmatmul.mubr.bf16.vlgmr.msra.gmra.mrb[32].mxu1 %v2327_v31  ;;  %3445 = vmatmul.mubr.bf16.vlgmr.msra.gmra.mrb[32].mxu0 %v2329_v32  ;;  %v2299_v18 = vmax.f32 %v2072_v41, 0.0  ;;  %v2301_v62 = vmax.f32 %v2115_v42, 0.0  ;;  %v4644_v44 = vld [vmem:[%s4902_s18 + $0x198] sm:$0xff]   ;;  %v4646_v50 = vld [vmem:[%s4902_s18 + $0x1e0] sm:$0xff]  }
 0xa1e   : > { %v2078_v57 = vadd.f32 %v2077_v53, %v1731_v11  ;;  %v2121_v59 = vadd.f32 %v2120_v54, %v1739_v12  ;;  %4255 = vmatpush3.bf16.msra.mxu1 %v4631_v40  ;;  %4277 = vmatpush3.bf16.msra.mxu0 %v4632_v15  ;;  %v2300_v14 = vmax.f32 %v2074_v48, 0.0  ;;  %v2302_v2 = vmax.f32 %v2117_v49, 0.0  ;;  %v4640_v11 = vld [vmem:[%s4902_s18 + $0x190] sm:$0xff]   ;;  %v4645_v49 = vld [vmem:[%s4902_s18 + $0x160] sm:$0xff]  }
 0xa1f   : > { %v2315_v33 = vmax.f32 %v2076_v51, 0.0  ;;  %v2317_v63 = vmax.f32 %v2119_v52, 0.0  ;;  %4256 = vmatprep.subr.bf16.mxu1 %v4633_v45  ;;  %4278 = vmatprep.subr.bf16.mxu0 %v4634_v46  ;;  %v1759_v32 = vrot.slane %v5206_v29, %v5097_v17  ;;  %v1767_v40 = vrot.slane %v5206_v29, %v5196_v58 }
 0xa20   : > { %v2316_v5 = vmax.f32 %v2078_v57, 0.0  ;;  %v2318_v6 = vmax.f32 %v2121_v59, 0.0  ;;  %v1763_v15 = vrot.slane %v5206_v29, %v5102_v19  ;;  %v1771_v17 = vrot.slane %v5206_v29, %v5199_v61  ;;  %v4647_v59 = vld [vmem:[%s4902_s18 + $0x120] sm:$0xff]  }
 0xa21   : > { %v5224_v7 = vpack.c.bf16 %v2315_v33, %v2299_v18  ;;  %v5226_v8 = vpack.c.bf16 %v2317_v63, %v2301_v62  ;;  %v4649_v33 = vld [vmem:[%s4902_s18 + $0x168] sm:$0xff]  }
 0xa22   : > { %v2332_v21 = vpack.c.bf16 %v2316_v5, %v2300_v14  ;;  %v2334_v9 = vpack.c.bf16 %v2318_v6, %v2302_v2  ;;  %4257 = vmatpush3.bf16.msra.mxu1 %v4635_v60  ;;  %4279 = vmatpush3.bf16.msra.mxu0 %v4636_v28  ;;  %v2157_v3 = vpop.f32.mrb[24].mxu1  ;;  %v2200_v10 = vpop.f32.mrb[24].mxu0  ;;  %v4648_v60 = vld [vmem:[%s4902_s18 + $0x1a0] sm:$0xff]   ;;  %v4650_v63 = vld [vmem:[%s4902_s18 + $0x1e8] sm:$0xff]  }
 0xa23   : > { %v2158_v12 = vadd.f32 %v2157_v3, %v1743_v47  ;;  %v2201_v26 = vadd.f32 %v2200_v10, %v1751_v56  ;;  %v2159_v4 = vpop.f32.mrb[25].mxu1  ;;  %v2202_v20 = vpop.f32.mrb[25].mxu0  ;;  %4258 = vmatprep.subr.bf16.mxu1 %v4637_v0  ;;  %4280 = vmatprep.subr.bf16.mxu0 %v4638_v1 }
 0xa24   : > { %v2160_v24 = vadd.f32 %v2159_v4, %v1747_v16  ;;  %v2203_v25 = vadd.f32 %v2202_v20, %v1755_v34  ;;  %v2161_v27 = vpop.f32.mrb[26].mxu1  ;;  %v2204_v31 = vpop.f32.mrb[26].mxu0  ;;  %3485 = vmatprep.mubr.bf16.mxu1 %v2332_v21  ;;  %3526 = vmatprep.mubr.bf16.mxu0 %v2334_v9 }
 0xa25   : > { %v2162_v35 = vadd.f32 %v2161_v27, %v1743_v47  ;;  %v2205_v36 = vadd.f32 %v2204_v31, %v1751_v56  ;;  %v2163_v39 = vpop.f32.mrb[27].mxu1  ;;  %v2206_v30 = vpop.f32.mrb[27].mxu0  ;;  %v2303_v45 = vmax.f32 %v2158_v12, 0.0  ;;  %v2305_v46 = vmax.f32 %v2201_v26, 0.0 }
 0xa26   : > { %v2164_v41 = vadd.f32 %v2163_v39, %v1747_v16  ;;  %v2207_v42 = vadd.f32 %v2206_v30, %v1755_v34  ;;  %4259 = vmatpush3.bf16.msra.mxu1 %v4639_v13  ;;  %4281 = vmatpush3.bf16.msra.mxu0 %v4640_v11  ;;  %v2304_v19 = vmax.f32 %v2160_v24, 0.0  ;;  %v2306_v55 = vmax.f32 %v2203_v25, 0.0  ;;  %v4651_v13 = vld [vmem:[%s4902_s18 + $0x128] sm:$0xff]   ;;  %v4655_v30 = vld [vmem:[%s4902_s18 + $0x130] sm:$0xff]  }
 0xa27   : > { %v2319_v47 = vmax.f32 %v2162_v35, 0.0  ;;  %v2321_v48 = vmax.f32 %v2205_v36, 0.0  ;;  %4260 = vmatprep.subr.bf16.mxu1 %v4641_v22  ;;  %4282 = vmatprep.subr.bf16.mxu0 %v4642_v23  ;;  %v4652_v11 = vld [vmem:[%s4902_s18 + $0x1a8] sm:$0xff]   ;;  %v4653_v22 = vld [vmem:[%s4902_s18 + $0x170] sm:$0xff]  }
 0xa28   : > { %v2320_v56 = vmax.f32 %v2164_v41, 0.0  ;;  %v2322_v51 = vmax.f32 %v2207_v42, 0.0  ;;  %v4654_v23 = vld [vmem:[%s4902_s18 + $0x1f0] sm:$0xff]   ;;  %v4658_v41 = vld [vmem:[%s4902_s18 + $0x1f8] sm:$0xff]  }
 0xa29   : > { %v5244_v52 = vpack.c.bf16 %v2319_v47, %v2303_v45  ;;  %v5246_v53 = vpack.c.bf16 %v2321_v48, %v2305_v46  ;;  %v4659_v42 = vld [vmem:[%s4902_s18 + $0x138] sm:$0xff]   ;;  %v4663_v45 = vld [vmem:[%s4902_s18 + $0x200] sm:$0xff]   ;;  %v4665_v47 = vld [vmem:[%s4902_s18 + $0x248] sm:$0xff]  }
 0xa2a   : > { %v5248_v29 = vpack.c.bf16 %v2320_v56, %v2304_v19  ;;  %v5250_v54 = vpack.c.bf16 %v2322_v51, %v2306_v55  ;;  %4261 = vmatpush3.bf16.msra.mxu1 %v4643_v43  ;;  %4283 = vmatpush3.bf16.msra.mxu0 %v4644_v44  ;;  %v2243_v16 = vpop.f32.mrb[28].mxu1  ;;  %v2286_v57 = vpop.f32.mrb[28].mxu0  ;;  %v4660_v43 = vld [vmem:[%s4902_s18 + $0x1b8] sm:$0xff]   ;;  %v4661_v44 = vld [vmem:[%s4902_s18 + $0x240] sm:$0xff]   ;;  %v4666_v48 = vld [vmem:[%s4902_s18 + $0x2c8] sm:$0xff]  }
 0xa2b   : > { %v2244_v28 = vadd.f32 %v2243_v16, %v1759_v32  ;;  %v2287_v34 = vadd.f32 %v2286_v57, %v1767_v40  ;;  %v2245_v18 = vpop.f32.mrb[29].mxu1  ;;  %v2288_v62 = vpop.f32.mrb[29].mxu0  ;;  %4262 = vmatprep.subr.bf16.mxu1 %v4645_v49  ;;  %4284 = vmatprep.subr.bf16.mxu0 %v4646_v50  ;;  %v4664_v46 = vld [vmem:[%s4902_s18 + $0x280] sm:$0xff]   ;;  %v4667_v49 = vld [vmem:[%s4902_s18 + $0x208] sm:$0xff]   ;;  %v4669_v19 = vld [vmem:[%s4902_s18 + $0x250] sm:$0xff]  }
 0xa2c   : > { %v2246_v0 = vadd.f32 %v2245_v18, %v1763_v15  ;;  %v2289_v1 = vadd.f32 %v2288_v62, %v1771_v17  ;;  %v2247_v14 = vpop.f32.mrb[30].mxu1  ;;  %v2290_v2 = vpop.f32.mrb[30].mxu0  ;;  %v4668_v50 = vld [vmem:[%s4902_s18 + $0x288] sm:$0xff]   ;;  %v4672_v55 = vld [vmem:[%s4902_s18 + $0x290] sm:$0xff]   ;;  %v4673_v56 = vld [vmem:[%s4902_s18 + $0x258] sm:$0xff]  }
 0xa2d   : > { %v2248_v5 = vadd.f32 %v2247_v14, %v1759_v32  ;;  %v2291_v6 = vadd.f32 %v2290_v2, %v1767_v40  ;;  %v2249_v21 = vpop.f32.mrb[31].mxu1  ;;  %v2292_v9 = vpop.f32.mrb[31].mxu0  ;;  %v2307_v12 = vmax.f32 %v2244_v28, 0.0  ;;  %v2309_v26 = vmax.f32 %v2287_v34, 0.0  ;;  %v4656_v40 = vld [vmem:[%s4902_s18 + $0x1b0] sm:$0xff]   ;;  %v4674_v51 = vld [vmem:[%s4902_s18 + $0x2d8] sm:$0xff]  }
 0xa2e   : > { %v2250_v3 = vadd.f32 %v2249_v21, %v1763_v15  ;;  %v2293_v10 = vadd.f32 %v2292_v9, %v1771_v17  ;;  %4263 = vmatpush3.bf16.msra.mxu1 %v4647_v59  ;;  %4285 = vmatpush3.bf16.msra.mxu0 %v4648_v60  ;;  %v2308_v24 = vmax.f32 %v2246_v0, 0.0  ;;  %v2310_v25 = vmax.f32 %v2289_v1, 0.0  ;;  %v4657_v15 = vld [vmem:[%s4902_s18 + $0x178] sm:$0xff]   ;;  %v4662_v17 = vld [vmem:[%s4902_s18 + $0x2c0] sm:$0xff]   ;;  %v4681_v28 = vld [vmem:[%s4902_s18 + $0x268] sm:$0xff]  }
 0xa2f   : > { %v2323_v4 = vmax.f32 %v2248_v5, 0.0  ;;  %v2325_v20 = vmax.f32 %v2291_v6, 0.0  ;;  %4264 = vmatprep.subr.bf16.mxu1 %v4649_v33  ;;  %4286 = vmatprep.subr.bf16.mxu0 %v4650_v63  ;;  %v4677_v16 = vld [vmem:[%s4902_s18 + $0x260] sm:$0xff]   ;;  %v4682_v34 = vld [vmem:[%s4902_s18 + $0x2e8] sm:$0xff]   ;;  %v4685_v33 = vld [vmem:[%s4902_s18 + $0x270] sm:$0xff]  }
 0xa30   : > { %v2324_v27 = vmax.f32 %v2250_v3, 0.0  ;;  %v2326_v31 = vmax.f32 %v2293_v10, 0.0  ;;  %v4678_v57 = vld [vmem:[%s4902_s18 + $0x2e0] sm:$0xff]   ;;  %v4683_v18 = vld [vmem:[%s4902_s18 + $0x228] sm:$0xff]   ;;  %v4686_v63 = vld [vmem:[%s4902_s18 + $0x2f0] sm:$0xff]  }
 0xa31   : > { %v5260_v32 = vpack.c.bf16 %v2323_v4, %v2307_v12  ;;  %v5262_v35 = vpack.c.bf16 %v2325_v20, %v2309_v26  ;;  %v4679_v59 = vld [vmem:[%s4902_s18 + $0x220] sm:$0xff]   ;;  %v4684_v62 = vld [vmem:[%s4902_s18 + $0x2a8] sm:$0xff]   ;;  %v4687_v0 = vld [vmem:[%s4902_s18 + $0x230] sm:$0xff]  }
 0xa32   : > { %v5264_v36 = vpack.c.bf16 %v2324_v27, %v2308_v24  ;;  %v5266_v39 = vpack.c.bf16 %v2326_v31, %v2310_v25  ;;  %4265 = vmatpush3.bf16.msra.mxu1 %v4651_v13  ;;  %4287 = vmatpush3.bf16.msra.mxu0 %v4652_v11  ;;  %v4680_v60 = vld [vmem:[%s4902_s18 + $0x2a0] sm:$0xff]   ;;  %v4688_v1 = vld [vmem:[%s4902_s18 + $0x2b0] sm:$0xff]   ;;  %v4689_v14 = vld [vmem:[%s4902_s18 + $0x278] sm:$0xff]  }
 0xa33   : > { %4266 = vmatprep.subr.bf16.mxu1 %v4653_v22  ;;  %4288 = vmatprep.subr.bf16.mxu0 %v4654_v23  ;;  %v4690_v2 = vld [vmem:[%s4902_s18 + $0x2f8] sm:$0xff]   ;;  %v4693_v21 = vld [vmem:[%s4902_s18 + $0x340] sm:$0xff]   ;;  %v4697_v13 = vld [vmem:[%s4902_s18 + $0x348] sm:$0xff]  }
 0xa34   : > { %v4691_v5 = vld [vmem:[%s4902_s18 + $0x238] sm:$0xff]   ;;  %v4694_v9 = vld [vmem:[%s4902_s18 + $0x3c0] sm:$0xff]   ;;  %v4698_v11 = vld [vmem:[%s4902_s18 + $0x3c8] sm:$0xff]  }
 0xa35   : > { %v4692_v6 = vld [vmem:[%s4902_s18 + $0x2b8] sm:$0xff]   ;;  %v4695_v3 = vld [vmem:[%s4902_s18 + $0x300] sm:$0xff]   ;;  %v4699_v12 = vld [vmem:[%s4902_s18 + $0x308] sm:$0xff]  }
 0xa36   : > { %4267 = vmatpush3.bf16.msra.mxu1 %v4655_v30  ;;  %4289 = vmatpush3.bf16.msra.mxu0 %v4656_v40  ;;  %v4696_v10 = vld [vmem:[%s4902_s18 + $0x380] sm:$0xff]   ;;  %v4700_v26 = vld [vmem:[%s4902_s18 + $0x388] sm:$0xff]   ;;  %v4701_v4 = vld [vmem:[%s4902_s18 + $0x350] sm:$0xff]  }
 0xa37   : > { %4268 = vmatprep.subr.bf16.mxu1 %v4657_v15  ;;  %4290 = vmatprep.subr.bf16.mxu0 %v4658_v41  ;;  %v4704_v20 = vld [vmem:[%s4902_s18 + $0x390] sm:$0xff]   ;;  %v4705_v22 = vld [vmem:[%s4902_s18 + $0x358] sm:$0xff]   ;;  %v4709_v27 = vld [vmem:[%s4902_s18 + $0x360] sm:$0xff]  }
 0xa38   : > { %v4706_v23 = vld [vmem:[%s4902_s18 + $0x3d8] sm:$0xff]   ;;  %v4710_v31 = vld [vmem:[%s4902_s18 + $0x3e0] sm:$0xff]   ;;  %v4713_v30 = vld [vmem:[%s4902_s18 + $0x368] sm:$0xff]  }
 0xa39   : > { %v4707_v24 = vld [vmem:[%s4902_s18 + $0x318] sm:$0xff]   ;;  %v4714_v40 = vld [vmem:[%s4902_s18 + $0x3e8] sm:$0xff]  }
 0xa3a   : > { %4269 = vmatpush3.bf16.msra.mxu1 %v4659_v42  ;;  %4291 = vmatpush3.bf16.msra.mxu0 %v4660_v43  ;;  %v4708_v25 = vld [vmem:[%s4902_s18 + $0x398] sm:$0xff]   ;;  %v4715_v15 = vld [vmem:[%s4902_s18 + $0x328] sm:$0xff]   ;;  %v4717_v42 = vld [vmem:[%s4902_s18 + $0x370] sm:$0xff]  }
 0xa3b   : > { %4298 = vmatprep.subr.bf16.mxu1 %v4661_v44  ;;  %4320 = vmatprep.subr.bf16.mxu0 %v4662_v17  ;;  %v4716_v41 = vld [vmem:[%s4902_s18 + $0x3a8] sm:$0xff]   ;;  %v4718_v43 = vld [vmem:[%s4902_s18 + $0x3f0] sm:$0xff]  }
 0xa3c   : > { %v4719_v44 = vld [vmem:[%s4902_s18 + $0x330] sm:$0xff]  }
 0xa3d   : > { %3486 = vmatmul.mubr.bf16.vlgmr.msra.gmra.mrb[36].mxu1 %v5224_v7  ;;  %3527 = vmatmul.mubr.bf16.vlgmr.msra.gmra.mrb[36].mxu0 %v5226_v8  ;;  %v4670_v7 = vld [vmem:[%s4902_s18 + $0x2d0] sm:$0xff]  }
 0xa3e   : > { %4299 = vmatpush3.bf16.msra.mxu1 %v4663_v45  ;;  %3567 = vmatprep.mubr.bf16.mxu1 %v5248_v29  ;;  %v4671_v8 = vld [vmem:[%s4902_s18 + $0x210] sm:$0xff]   ;;  %v4675_v29 = vld [vmem:[%s4902_s18 + $0x218] sm:$0xff]  }
 0xa3f   : > { %4321 = vmatpush3.bf16.msra.mxu0 %v4664_v46  ;;  %3608 = vmatprep.mubr.bf16.mxu0 %v5250_v54  ;;  %v4676_v54 = vld [vmem:[%s4902_s18 + $0x298] sm:$0xff]   ;;  %v4720_v17 = vld [vmem:[%s4902_s18 + $0x3b0] sm:$0xff]  }
 0xa40   : > { %4300 = vmatprep.subr.bf16.mxu1 %v4665_v47  ;;  %4322 = vmatprep.subr.bf16.mxu0 %v4666_v48  ;;  %v4721_v45 = vld [vmem:[%s4902_s18 + $0x378] sm:$0xff]  }
 0xa41   : > { %v4722_v46 = vld [vmem:[%s4902_s18 + $0x3f8] sm:$0xff]  }
 0xa42   : > { %4301 = vmatpush3.bf16.msra.mxu1 %v4667_v49  ;;  %v4723_v47 = vld [vmem:[%s4902_s18 + $0x338] sm:$0xff]  }
 0xa43   : > { %4323 = vmatpush3.bf16.msra.mxu0 %v4668_v50  ;;  %4302 = vmatprep.subr.bf16.mxu1 %v4669_v19  ;;  %v4724_v48 = vld [vmem:[%s4902_s18 + $0x3b8] sm:$0xff]   ;;  %v5349_v19 = vld [vmem:[%s4897_s15] sm:$0xff] }
 0xa44   : > { %4324 = vmatprep.subr.bf16.mxu0 %v4670_v7  ;;  %v2602_v7 = vrot.slane %v5349_v19, %v5196_v58 }
 0xa46   : > { %4303 = vmatpush3.bf16.msra.mxu1 %v4671_v8 }
 0xa47   : > { %4325 = vmatpush3.bf16.msra.mxu0 %v4672_v55  ;;  %4304 = vmatprep.subr.bf16.mxu1 %v4673_v56 }
 0xa48   : > { %4326 = vmatprep.subr.bf16.mxu0 %v4674_v51 }
 0xa4a   : > { %4305 = vmatpush3.bf16.msra.mxu1 %v4675_v29 }
 0xa4b   : > { %4327 = vmatpush3.bf16.msra.mxu0 %v4676_v54  ;;  %4306 = vmatprep.subr.bf16.mxu1 %v4677_v16 }
 0xa4c   : > { %4328 = vmatprep.subr.bf16.mxu0 %v4678_v57 }
 0xa4e   : > { %4307 = vmatpush3.bf16.msra.mxu1 %v4679_v59 }
 0xa4f   : > { %4329 = vmatpush3.bf16.msra.mxu0 %v4680_v60  ;;  %4308 = vmatprep.subr.bf16.mxu1 %v4681_v28 }
 0xa50   : > { %4330 = vmatprep.subr.bf16.mxu0 %v4682_v34 }
 0xa52   : > { %4309 = vmatpush3.bf16.msra.mxu1 %v4683_v18 }
 0xa53   : > { %4331 = vmatpush3.bf16.msra.mxu0 %v4684_v62  ;;  %4310 = vmatprep.subr.bf16.mxu1 %v4685_v33 }
 0xa54   : > { %4332 = vmatprep.subr.bf16.mxu0 %v4686_v63 }
 0xa56   : > { %4311 = vmatpush3.bf16.msra.mxu1 %v4687_v0 }
 0xa57   : > { %4333 = vmatpush3.bf16.msra.mxu0 %v4688_v1  ;;  %4312 = vmatprep.subr.bf16.mxu1 %v4689_v14 }
 0xa58   : > { %4334 = vmatprep.subr.bf16.mxu0 %v4690_v2 }
 0xa5a   : > { %4313 = vmatpush3.bf16.msra.mxu1 %v4691_v5 }
 0xa5b   : > { %4335 = vmatpush3.bf16.msra.mxu0 %v4692_v6  ;;  %4342 = vmatprep.subr.bf16.mxu1 %v4693_v21 }
 0xa5c   : > { %4364 = vmatprep.subr.bf16.mxu0 %v4694_v9 }
 0xa5d   : > { %3568 = vmatmul.mubr.bf16.vlgmr.msra.gmra.mrb[40].mxu1 %v5244_v52  ;;  %v4702_v52 = vld [vmem:[%s4902_s18 + $0x3d0] sm:$0xff]  }
 0xa5e   : > { %3609 = vmatmul.mubr.bf16.vlgmr.msra.gmra.mrb[40].mxu0 %v5246_v53  ;;  %4343 = vmatpush3.bf16.msra.mxu1 %v4695_v3  ;;  %v4703_v53 = vld [vmem:[%s4902_s18 + $0x310] sm:$0xff]  }
 0xa5f   : > { %3649 = vmatprep.mubr.bf16.mxu1 %v5264_v36  ;;  %4365 = vmatpush3.bf16.msra.mxu0 %v4696_v10  ;;  %v4711_v36 = vld [vmem:[%s4902_s18 + $0x320] sm:$0xff]  }
 0xa60   : > { %3690 = vmatprep.mubr.bf16.mxu0 %v5266_v39  ;;  %4344 = vmatprep.subr.bf16.mxu1 %v4697_v13  ;;  %v4712_v39 = vld [vmem:[%s4902_s18 + $0x3a0] sm:$0xff]  }
 0xa61   : > { %4366 = vmatprep.subr.bf16.mxu0 %v4698_v11 }
 0xa62   : > { %4345 = vmatpush3.bf16.msra.mxu1 %v4699_v12 }
 0xa63   : > { %4367 = vmatpush3.bf16.msra.mxu0 %v4700_v26  ;;  %4346 = vmatprep.subr.bf16.mxu1 %v4701_v4 }
 0xa64   : > { %4368 = vmatprep.subr.bf16.mxu0 %v4702_v52 }
 0xa66   : > { %4347 = vmatpush3.bf16.msra.mxu1 %v4703_v53 }
 0xa67   : > { %4369 = vmatpush3.bf16.msra.mxu0 %v4704_v20  ;;  %4348 = vmatprep.subr.bf16.mxu1 %v4705_v22 }
 0xa68   : > { %4370 = vmatprep.subr.bf16.mxu0 %v4706_v23 }
 0xa6a   : > { %4349 = vmatpush3.bf16.msra.mxu1 %v4707_v24 }
 0xa6b   : > { %4371 = vmatpush3.bf16.msra.mxu0 %v4708_v25  ;;  %4350 = vmatprep.subr.bf16.mxu1 %v4709_v27 }
 0xa6c   : > { %4372 = vmatprep.subr.bf16.mxu0 %v4710_v31 }
 0xa6e   : > { %4351 = vmatpush3.bf16.msra.mxu1 %v4711_v36 }
 0xa6f   : > { %4373 = vmatpush3.bf16.msra.mxu0 %v4712_v39  ;;  %4352 = vmatprep.subr.bf16.mxu1 %v4713_v30 }
 0xa70   : > { %4374 = vmatprep.subr.bf16.mxu0 %v4714_v40 }
 0xa72   : > { %4353 = vmatpush3.bf16.msra.mxu1 %v4715_v15 }
 0xa73   : > { %4375 = vmatpush3.bf16.msra.mxu0 %v4716_v41  ;;  %4354 = vmatprep.subr.bf16.mxu1 %v4717_v42 }
 0xa74   : > { %4376 = vmatprep.subr.bf16.mxu0 %v4718_v43 }
 0xa76   : > { %4355 = vmatpush3.bf16.msra.mxu1 %v4719_v44 }
 0xa77   : > { %4377 = vmatpush3.bf16.msra.mxu0 %v4720_v17  ;;  %4356 = vmatprep.subr.bf16.mxu1 %v4721_v45 }
 0xa78   : > { %4378 = vmatprep.subr.bf16.mxu0 %v4722_v46 }
 0xa7a   : > { %4357 = vmatpush3.bf16.msra.mxu1 %v4723_v47 }
 0xa7b   : > { %4379 = vmatpush3.bf16.msra.mxu0 %v4724_v48 }
 0xa7d   : > { %3650 = vmatmul.mubr.bf16.vlgmr.msra.gmra.mrb[44].mxu1 %v5260_v32 }
 0xa7e   : > { %3691 = vmatmul.mubr.bf16.vlgmr.msra.gmra.mrb[44].mxu0 %v5262_v35 }
 0xaf0   : > { %v4226_v49 = vpop.f32.mrb[32].mxu1  ;;  %v4248_v50 = vpop.f32.mrb[32].mxu0 }
 0xaf1   : > { %v4227_v8 = vpop.f32.mrb[33].mxu1  ;;  %v4249_v55 = vpop.f32.mrb[33].mxu0 }
 0xaf2   : > { %v4228_v56 = vadd.f32 %v4227_v8, %v4226_v49  ;;  %v4250_v51 = vadd.f32 %v4249_v55, %v4248_v50  ;;  %v4229_v29 = vpop.f32.mrb[34].mxu1  ;;  %v4251_v54 = vpop.f32.mrb[34].mxu0 }
 0xaf3   : > { %v4230_v16 = vpop.f32.mrb[35].mxu1  ;;  %v4252_v57 = vpop.f32.mrb[35].mxu0 }
 0xaf4   : > { %v3406_v59 = vadd.f32 %v4228_v56, %v2602_v7  ;;  %v4231_v60 = vadd.f32 %v4230_v16, %v4229_v29  ;;  %v4253_v32 = vadd.f32 %v4252_v57, %v4251_v54 }
 0xaf6   : > { %v3447_v28 = vadd.f32 %v4250_v51, %v3406_v59  ;;  %v3409_v35 = vadd.f32 %v4231_v60, %v2602_v7 }
 0xaf8   : > { %v3450_v34 = vadd.f32 %v4253_v32, %v3409_v35 }
 0xb10   : > { %v4270_v18 = vpop.f32.mrb[36].mxu1  ;;  %v4292_v62 = vpop.f32.mrb[36].mxu0 }
 0xb11   : > { %v4271_v33 = vpop.f32.mrb[37].mxu1  ;;  %v4293_v63 = vpop.f32.mrb[37].mxu0 }
 0xb12   : > { %v4272_v0 = vadd.f32 %v4271_v33, %v4270_v18  ;;  %v4294_v58 = vadd.f32 %v4293_v63, %v4292_v62  ;;  %v4273_v1 = vpop.f32.mrb[38].mxu1  ;;  %v4295_v14 = vpop.f32.mrb[38].mxu0 }
 0xb13   : > { %v4274_v2 = vpop.f32.mrb[39].mxu1  ;;  %v4296_v5 = vpop.f32.mrb[39].mxu0 }
 0xb14   : > { %v3488_v6 = vadd.f32 %v4272_v0, %v3447_v28  ;;  %v4275_v21 = vadd.f32 %v4274_v2, %v4273_v1  ;;  %v4297_v9 = vadd.f32 %v4296_v5, %v4295_v14  ;;  %v3730_v1 = vrot.slane %v5349_v19, %v5199_v61  ;;  %v4768_v61 = vld [vmem:[%s5394_s10] sm:$0xff] (!%p4152_p5)  }
 0xb15   : > { %v4787_v19 = vmov (!%p4152_p5), 0.0  }
 0xb16   : > { %v3529_v3 = vadd.f32 %v4294_v58, %v3488_v6  ;;  %v3491_v10 = vadd.f32 %v4275_v21, %v3450_v34  ;;  %v4151_v6 = vld [vmem:[%s4897_s15 + $0x8] ss:$0 sm:$0xff]  ;;  %4477 = vmatprep.subr.bf16.mxu0 (!%p4152_p5), %v4787_v19  ;;  %4481 = vmatprep.mubr.msk.bf16.mxu0 (!%p4152_p5), %vm4788_vm7, %v4787_v19 }
 0xb17   : > { %4478 = vmatpush3.bf16.msra.mxu0 (!%p4152_p5), %v4768_v61 }
 0xb18   : > { %v3532_v13 = vadd.f32 %v4297_v9, %v3491_v10  ;;  %4479 = vmatprep.subr.bf16.mxu0 (!%p4152_p5), %v4787_v19 }
 0xb30   : > { %v4314_v11 = vpop.f32.mrb[40].mxu1 }
 0xb31   : > { %v4336_v12 = vpop.f32.mrb[40].mxu0  ;;  %v4315_v26 = vpop.f32.mrb[41].mxu1 }
 0xb32   : > { %v4316_v4 = vadd.f32 %v4315_v26, %v4314_v11  ;;  %v4337_v52 = vpop.f32.mrb[41].mxu0  ;;  %v4317_v53 = vpop.f32.mrb[42].mxu1  ;;  %v4769_v11 = vld [vmem:[%s5394_s10 + $0x8] sm:$0xff] (!%p4152_p5)   ;;  %v4153_v26 = vld [vmem:[%s5395_s11] ss:$0 sm:$0xff] (!%p4152_p5) }
 0xb33   : > { %v4338_v20 = vadd.f32 %v4337_v52, %v4336_v12  ;;  %v4339_v22 = vpop.f32.mrb[42].mxu0  ;;  %v4318_v23 = vpop.f32.mrb[43].mxu1  ;;  %4480 = vmatpush3.bf16.msra.mxu0 (!%p4152_p5), %v4769_v11 }
 0xb34   : > { %v3570_v24 = vadd.f32 %v4316_v4, %v3529_v3  ;;  %v4319_v25 = vadd.f32 %v4318_v23, %v4317_v53  ;;  %v4340_v27 = vpop.f32.mrb[43].mxu0 }
 0xb35   : > { %v4341_v31 = vadd.f32 %v4340_v27, %v4339_v22 }
 0xb36   : > { %v3611_v36 = vadd.f32 %v4338_v20, %v3570_v24  ;;  %v3573_v39 = vadd.f32 %v4319_v25, %v3532_v13 }
 0xb38   : > { %v3614_v30 = vadd.f32 %v4341_v31, %v3573_v39 }
 0xb50   : > { %v4358_v40 = vpop.f32.mrb[44].mxu1 }
 0xb51   : > { %v4380_v15 = vpop.f32.mrb[44].mxu0  ;;  %v4359_v41 = vpop.f32.mrb[45].mxu1 }
 0xb52   : > { %v4360_v42 = vadd.f32 %v4359_v41, %v4358_v40  ;;  %v4381_v43 = vpop.f32.mrb[45].mxu0  ;;  %v4361_v44 = vpop.f32.mrb[46].mxu1 }
 0xb53   : > { %v4382_v17 = vadd.f32 %v4381_v43, %v4380_v15  ;;  %v4383_v45 = vpop.f32.mrb[46].mxu0  ;;  %v4362_v46 = vpop.f32.mrb[47].mxu1 }
 0xb54   : > { %v3652_v47 = vadd.f32 %v4360_v42, %v3611_v36  ;;  %v4363_v48 = vadd.f32 %v4362_v46, %v4361_v44  ;;  %v4384_v49 = vpop.f32.mrb[47].mxu0 }
 0xb55   : > { %v4385_v50 = vadd.f32 %v4384_v49, %v4383_v45 }
 0xb56   : > { %v3693_v7 = vadd.f32 %v4382_v17, %v3652_v47  ;;  %v3655_v8 = vadd.f32 %v4363_v48, %v3614_v30 }
 0xb58   : > { %v3696_v55 = vadd.f32 %v4385_v50, %v3655_v8  ;;  %v3699_v56 = vadd.f32 %v3693_v7, %v5110_v37 }
 0xb5a   : > { %v3701_v51 = vsel %vm571_vm2, %v3699_v56, 0.0  ;;  %v3700_v29 = vadd.f32 %v3696_v55, %v5112_v38 }
 0xb5b   : > { %3702 = vadd.xlane.f32.xlu0 %v3701_v51 }
 0xb5c   : > { %v3704_v54 = vsel %vm571_vm2, %v3700_v29, 0.0 }
 0xb5d   : > { %3705 = vadd.xlane.f32.xlu1 %v3704_v54 }
 0xbe8   : > { %v3703_v16 = vpop.xlane.xlu0 %3702 }
 0xbe9   : > { %v3707_v57 = vmul.f32 0.03125, %v3703_v16 }
 0xbea   : > { %v3706_v59 = vpop.xlane.xlu1 %3705 }
 0xbeb   : > { %v3709_v60 = vsub.f32 %v3699_v56, %v3707_v57  ;;  %v3708_v32 = vmul.f32 0.03125, %v3706_v59 }
 0xbed   : > { %v3710_v28 = vsub.f32 %v3700_v29, %v3708_v32  ;;  %v3711_v35 = vmul.f32 %v3709_v60, %v3709_v60 }
 0xbef   : > { %v3713_v34 = vsel %vm571_vm2, %v3711_v35, 0.0  ;;  %v3712_v18 = vmul.f32 %v3710_v28, %v3710_v28 }
 0xbf0   : > { %3714 = vadd.xlane.f32.xlu0 %v3713_v34 }
 0xbf1   : > { %v3716_v37 = vsel %vm571_vm2, %v3712_v18, 0.0 }
 0xbf2   : > { %3717 = vadd.xlane.f32.xlu1 %v3716_v37 }
 0xc7d   : > { %v3715_v38 = vpop.xlane.xlu0 %3714 }
 0xc7e   : > { %v3719_v62 = vmul.f32 0.03125, %v3715_v38 }
 0xc7f   : > { %v3718_v33 = vpop.xlane.xlu1 %3717 }
 0xc80   : > { %v3721_v63 = vadd.f32 1e-05, %v3719_v62  ;;  %v3720_v0 = vmul.f32 0.03125, %v3718_v33 }
 0xc82   : > { %4761 = vrsqrt.f32 %v3721_v63  ;;  %v3722_v58 = vadd.f32 1e-05, %v3720_v0 }
 0xc84   : > { %4763 = vrsqrt.f32 %v3722_v58 }
 0xc8c   : > { %v4762_v14 = vpop.eup %4761 }
 0xc8d   : > { %v3725_v2 = vmul.f32 %v4762_v14, %v3709_v60 }
 0xc8e   : > { %v4764_v5 = vpop.eup %4763 }
 0xc8f   : > { %v3731_v21 = vmul.f32 %v3730_v1, %v3725_v2  ;;  %v3726_v9 = vmul.f32 %v4764_v5, %v3710_v28  ;;  %3744 = sbr.rel (%p4152_p5) target bundleno = 3440 (0xd70), region = 76 }
 0xc91   : > { %v3737_v3 = vadd.f32 %v4151_v6, %v3731_v21  ;;  %v3732_v10 = vmul.f32 %v3730_v1, %v3726_v9 }
 0xc93   : > { %3739 = vst.msk [vmem:[#allocation2] sm:$0xff] %vm571_vm2, %v3737_v3  ;;  %v3738_v13 = vadd.f32 %v4151_v6, %v3732_v10 }
 0xc95   : > { %3740 = vst.msk [vmem:[#allocation2 + $0x8] sm:$0xff] %vm571_vm2, %v3738_v13  ;;  %v3745_v12 = vpack.c.bf16 (!%p4152_p5), %v3738_v13, %v3737_v3 }
 0xc97   : > { %4482 = vmatmul.mubr.msk.bf16.vlgmr.msra.gmra.mrb[0].mxu0 %vm571_vm2, %v3745_v12 }
 0xd6a   : > { %v3806_v4 = vpop.f32.mrb[0].mxu0 }
 0xd6b   : > { %v3807_v52 = vadd.f32 %v4153_v26, %v3806_v4  ;;  %v4483_v53 = vpop.f32.mrb[1].mxu0 }
 0xd6c   : > { %v3809_v20 = vpop.f32.mrb[2].mxu0 }
 0xd6d   : > { %3813 = vst [vmem:[%s5396_s12] sm:$0xff] %v3807_v52  ;;  %v3810_v22 = vadd.f32 %v4153_v26, %v3809_v20  ;;  %v4484_v23 = vpop.f32.mrb[3].mxu0 }
 0xd6f   : > { %3814 = vst [vmem:[%s5396_s12 + $0x8] sm:$0xff] %v3810_v22 }
 0xd70 PF: > { %s5407_s23 = sld [smem:[#allocation3_spill]] }
 0xd76   : > { %s22_s21 = sadd.s32 1, %s5407_s23  }
 0xd77   : > { %p19_p6 = scmp.ge.s32.totalorder %s22_s21, 4  }
 0xd79   :  { %21 = sbr.rel (!%p19_p6) target bundleno = 4 (0x4), region = 123 }

</bundles_post_ra>
